<compile_context>
chip_gen: v7x
topology: tpu7x:2x2x1
jax: 0.10.0
libtpu: 0.0.40
codegen_flags: <defaults>
</compile_context>

<pallas_src>
import functools
import math

import jax
import jax.numpy as jnp
from jax.experimental import pallas as pl
from jax.experimental.pallas import tpu as pltpu

NDIM = 16          # adaptor ndim (module arg)
RANK = 8           # adaptor rank (module arg; default 32, small here)
HID = 30           # conv out-channels == attention hidden_dim (fixed by module)
NHEADS = 5         # Multiheadattention(num_attention_heads=5, hidden_dim=30)
HEAD = HID // NHEADS   # 6
THRESH = 0.1       # gate threshold
EPS = 1e-5         # nn.LayerNorm default eps


# -----------------------------------------------------------------------------
# Fused kernel.  Grid = (batch, L-tile).  Per grid point (b, t):
#   x_ref   : (1, NDIM, LQT) input tile, channels-first (PyTorch NCL order)
#   ctx_ref : (1, NDIM, Lc)  full context of batch b, lane-dense (wrapper-transposed)
#   wd/bd/wu/bu/wc : adaptor weights, channels-first (shared by both paths)
#   wq/bq   : (NHEADS, HEAD, HID) / (NHEADS, HEAD, 1)  PRE-SCALED by 1/sqrt(HEAD)
#   wkt/bk  : (NHEADS, HID, HEAD) / (NHEADS, 1, HEAD)  (cold path only, f32)
#   wv/bv   : (NHEADS, HEAD, HID) / (NHEADS, HEAD, 1)  (cold path only, f32)
#   gamma/beta : (HID, 1) LayerNorm affine
#   o_ref   : (1, HID, LQT) lane-dense output tile of (B, 30, L)
#   k_sc    : (NHEADS, Lc, HEAD)     cached keys   (mxu_dtype)
#   v_sc    : (NHEADS, HEAD + 1, Lc) cached V^T with an extra all-ones row
#   att_sc  : (HID, LQT) f32         concat-free per-head output staging
# -----------------------------------------------------------------------------
def _fused_kernel(x_ref, ctx_ref,
                  wd_ref, bd_ref, wu_ref, bu_ref, wc_ref,
                  wq_ref, bq_ref, wkt_ref, bk_ref, wv_ref, bv_ref,
                  gamma_ref, beta_ref,
                  o_ref,
                  k_sc, v_sc, att_sc,
                  *, bf16_exp, mxu_dtype):
    f32 = jnp.float32

    # ---- once per batch (t == 0): context adaptor + K/V cache (cold path) ----
    @pl.when(pl.program_id(1) == 0)
    def _fill_kv_cache():
        c = ctx_ref[0]                                                   # (NDIM, Lc)
        down_c = jnp.dot(wd_ref[...], c, preferred_element_type=f32) + bd_ref[...]
        up_c = jnp.dot(wu_ref[...], down_c, preferred_element_type=f32) + bu_ref[...]
        a_ctx = jnp.dot(wc_ref[...], up_c + c.astype(f32),
                        preferred_element_type=f32)                      # (HID, Lc)
        ones_row = jnp.ones((1, v_sc.shape[-1]), v_sc.dtype)
        for h in range(NHEADS):
            # K_h (Lc, HEAD): contract the channel axis of both operands.
            kh = jax.lax.dot_general(a_ctx, wkt_ref[h],
                                     (((0,), (0,)), ((), ())),
                                     preferred_element_type=f32) + bk_ref[h]
            k_sc[h] = kh.astype(k_sc.dtype)
            # V_h^T (HEAD, Lc) plus an all-ones row -> softmax denominator comes
            # out of the PV matmul for free (row HEAD of ho below).
            vh = jnp.dot(wv_ref[h], a_ctx, preferred_element_type=f32) + bv_ref[h]
            v_sc[h, :HEAD, :] = vh.astype(v_sc.dtype)
            v_sc[h, HEAD:HEAD + 1, :] = ones_row

    # ---- adaptor on the input tile, channels-first (C, LQT): no transposes ----
    x = x_ref[0]                                                         # (NDIM, LQT)
    down = jnp.dot(wd_ref[...], x, preferred_element_type=f32) + bd_ref[...]
    up = jnp.dot(wu_ref[...], down, preferred_element_type=f32) + bu_ref[...]
    a_in = jnp.dot(wc_ref[...], up + x.astype(f32),
                   preferred_element_type=f32)                           # (HID, LQT)

    # ---- 5-head attention; Wq/bq pre-scaled, bf16 MXU operands, late normalize ----
    for h in range(NHEADS):
        qh = (jnp.dot(wq_ref[h], a_in, preferred_element_type=f32)
              + bq_ref[h]).astype(mxu_dtype)                             # (HEAD, LQT)
        s = jnp.dot(k_sc[h], qh, preferred_element_type=f32)             # (Lc, LQT)
        s = s - jnp.max(s, axis=0, keepdims=True)                        # stable softmax
        if bf16_exp:
            p = jnp.exp(s.astype(jnp.bfloat16))                          # bf16 EUP (v6e/v7x)
        else:
            p = jnp.exp(s).astype(mxu_dtype)                             # f32 EUP (v5e)
        # (HEAD+1, LQT): rows 0..5 = un-normalized PV, row 6 = softmax denominator.
        ho = jnp.dot(v_sc[h], p, preferred_element_type=f32)
        inv = pl.reciprocal(ho[HEAD:HEAD + 1, :], approx=True)
        att_sc[h * HEAD:(h + 1) * HEAD, :] = ho[:HEAD, :] * inv

    att = att_sc[...]                                                    # (HID, LQT)

    # ---- OCG gate (exactly as in the PyTorch reference: the input path is
    #      gated by att_sig when sigmoid(input) > threshold) ----
    input_sig = jax.nn.sigmoid(a_in)
    att_sig = 1.0 - input_sig
    g_input = jnp.where(input_sig > THRESH, att_sig, 0.0)
    g_att = jnp.where(att_sig > THRESH, att_sig, 0.0)
    fused = g_input * a_in + g_att * att

    # ---- LayerNorm over the channel (sublane) axis, biased variance, f32 ----
    mean = jnp.mean(fused, axis=0, keepdims=True)
    var = jnp.mean((fused - mean) ** 2, axis=0, keepdims=True)
    normed = (fused - mean) * jax.lax.rsqrt(var + EPS)
    o_ref[0] = (normed * gamma_ref[...] + beta_ref[...]).astype(o_ref.dtype)


# -----------------------------------------------------------------------------
# Wrapper
# -----------------------------------------------------------------------------
def _const_spec(shape):
    zeros = (0,) * len(shape)
    return pl.BlockSpec(shape, lambda b, t, _z=zeros: _z)


def _device_flags():
    kind = ""
    try:
        kind = jax.devices()[0].device_kind.lower()
    except Exception:
        pass
    is_v7 = ("v7" in kind) or ("7x" in kind)
    bf16_eltwise = is_v7 or ("v6" in kind)     # bf16 VPU/EUP only on v6e / v7x
    try:
        phys_vmem = int(pltpu.get_tpu_info().vmem_capacity_bytes)
    except Exception:
        phys_vmem = (64 if is_v7 else 128) * (1 << 20)
    return bf16_eltwise, phys_vmem


def _pick_lq_tile(L, Lc, phys_vmem):
    small_vmem = phys_vmem <= (80 << 20)        # v7x (64 MiB) vs v5e/v6e (128 MiB)
    max_tile = 512 if small_vmem else 1024
    if L <= max_tile:
        return L                                # one full (non-128-multiple-ok) block
    # Live per-head big temporaries: s (f32) + p (bf16) ~= 6 * Lc * lqt bytes.
    score_budget = (8 if small_vmem else 24) << 20
    cols = score_budget // max(1, 6 * Lc)
    return int(min(max_tile, max(128, (cols // 128) * 128)))


def context_gate_early_adaptor(x, context, params, *,
                               io_dtype=jnp.float32,
                               mxu_dtype=jnp.bfloat16,
                               out_dtype=None):
    """x: (B, ndim, L) PyTorch NCL; context: (B, Lc, ndim); returns (B, 30, L)."""
    B, C, L = x.shape
    Bc, Lc, Cc = context.shape
    assert C == NDIM and Cc == NDIM and Bc == B
    f32 = jnp.float32
    out_dtype = f32 if out_dtype is None else out_dtype

    bf16_eltwise, phys_vmem = _device_flags()
    lqt = _pick_lq_tile(L, Lc, phys_vmem)
    num_t = pl.cdiv(L, lqt)                     # ragged edge handled by masked writes

    x_p = x.astype(io_dtype)
    # One wrapper transpose makes the whole context path lane-dense in the kernel.
    ctx_p = jnp.transpose(context, (0, 2, 1)).astype(io_dtype)   # (B, NDIM, Lc)

    scale = 1.0 / math.sqrt(HEAD)
    wd = params["down_w"].astype(io_dtype)                       # (RANK, NDIM)
    wu = params["up_w"].astype(io_dtype)                         # (NDIM, RANK)
    wc = params["conv_w"][:, :, 0].astype(io_dtype)              # (HID, NDIM)
    bd = params["down_b"].reshape(RANK, 1).astype(f32)
    bu = params["up_b"].reshape(NDIM, 1).astype(f32)

    # 1/sqrt(HEAD) folded into the query projection (kills the per-head score scale).
    wq_h = (params["q_w"].reshape(NHEADS, HEAD, HID) * scale).astype(io_dtype)
    bq_h = (params["q_b"].reshape(NHEADS, HEAD, 1) * scale).astype(f32)
    # K/V weights are only used once per batch (cache fill) -> keep them f32.
    wkt_h = params["k_w"].reshape(NHEADS, HEAD, HID).transpose(0, 2, 1).astype(f32)
    bk_h = params["k_b"].reshape(NHEADS, 1, HEAD).astype(f32)
    wv_h = params["v_w"].reshape(NHEADS, HEAD, HID).astype(f32)
    bv_h = params["v_b"].reshape(NHEADS, HEAD, 1).astype(f32)
    gamma = params["ln_gamma"].reshape(HID, 1).astype(f32)
    beta = params["ln_beta"].reshape(HID, 1).astype(f32)

    inputs = (x_p, ctx_p, wd, bd, wu, bu, wc,
              wq_h, bq_h, wkt_h, bk_h, wv_h, bv_h, gamma, beta)

    in_specs = [
        pl.BlockSpec((1, NDIM, lqt), lambda b, t: (b, 0, t)),    # x tile
        pl.BlockSpec((1, NDIM, Lc), lambda b, t: (b, 0, 0)),     # full context of batch b
    ] + [_const_spec(a.shape) for a in inputs[2:]]

    # ---- VMEM budget (counts the lane padding of the per-head K cache) ----
    isz = jnp.dtype(io_dtype).itemsize
    osz = jnp.dtype(out_dtype).itemsize
    msz = jnp.dtype(mxu_dtype).itemsize
    est = (2 * isz * NDIM * lqt                  # x block, double buffered
           + 2 * isz * NDIM * Lc                 # context block
           + 2 * osz * HID * lqt                 # output block, double buffered
           + msz * NHEADS * Lc * 128             # K cache, lane-padded HEAD -> 128
           + msz * NHEADS * 8 * Lc               # V^T cache (+ ones row), lane-dense
           + (4 + msz) * Lc * lqt                # live s (f32) + p per head
           + 4 * 6 * HID * lqt                   # att scratch + gate/LN temporaries
           + 4 * 3 * HID * Lc)                   # cache-fill f32 temporaries
    cap = (40 << 20) if phys_vmem <= (80 << 20) else (64 << 20)
    vmem_limit = int(min(cap, max(16 << 20, 2 * est)))

    kernel = functools.partial(_fused_kernel,
                               bf16_exp=bool(bf16_eltwise),
                               mxu_dtype=mxu_dtype)

    return pl.pallas_call(
        kernel,
        out_shape=jax.ShapeDtypeStruct((B, HID, L), out_dtype),
        grid=(B, num_t),
        in_specs=in_specs,
        out_specs=pl.BlockSpec((1, HID, lqt), lambda b, t: (b, 0, t)),
        scratch_shapes=[
            pltpu.VMEM((NHEADS, Lc, HEAD), mxu_dtype),           # cached K
            pltpu.VMEM((NHEADS, HEAD + 1, Lc), mxu_dtype),       # cached V^T + ones row
            pltpu.VMEM((HID, lqt), jnp.float32),                 # concat-free head outputs
        ],
        compiler_params=pltpu.CompilerParams(
            dimension_semantics=("parallel", "arbitrary"),
            vmem_limit_bytes=vmem_limit),
    )(*inputs)


# -----------------------------------------------------------------------------
# Pure-JAX reference (eval mode) for a correctness check
# -----------------------------------------------------------------------------
def _reference(x, context, params):
    def adaptor(z_ncl):                                   # (B, C, S) -> (B, 30, S)
        zt = jnp.swapaxes(z_ncl, 1, 2)                    # (B, S, C)
        down = zt @ params["down_w"].T + params["down_b"]
        up = down @ params["up_w"].T + params["up_b"]     # dropout = identity (eval)
        s = jnp.swapaxes(up + zt, 1, 2)                   # (B, C, S)
        return jnp.einsum("oc,bcs->bos", params["conv_w"][:, :, 0], s)

    a_in = adaptor(x)                                                     # (B, 30, L)
    a_ctx = jnp.swapaxes(adaptor(jnp.swapaxes(context, 1, 2)), 1, 2)      # (B, Lc, 30)
    q_in = jnp.swapaxes(a_in, 1, 2)                                       # (B, L, 30)

    def proj(z, w, b):
        p = z @ w.T + b
        return p.reshape(z.shape[0], z.shape[1], NHEADS, HEAD).transpose(0, 2, 1, 3)

    Q = proj(q_in, params["q_w"], params["q_b"])
    K = proj(a_ctx, params["k_w"], params["k_b"])
    V = proj(a_ctx, params["v_w"], params["v_b"])
    score = jnp.einsum("bhqd,bhkd->bhqk", Q, K) / math.sqrt(HEAD)
    p = jax.nn.softmax(score, axis=-1)
    att = jnp.einsum("bhld,bhql->bqhd", V, p).reshape(q_in.shape[0], q_in.shape[1], HID)

    input_sig = jax.nn.sigmoid(q_in)
    att_sig = 1.0 - input_sig
    g_in = jnp.where(input_sig > THRESH, att_sig, 0.0)
    g_att = jnp.where(att_sig > THRESH, att_sig, 0.0)
    fused = g_in * q_in + g_att * att
    mean = fused.mean(-1, keepdims=True)
    var = ((fused - mean) ** 2).mean(-1, keepdims=True)
    ln = (fused - mean) / jnp.sqrt(var + EPS) * params["ln_gamma"] + params["ln_beta"]
    return jnp.swapaxes(ln, 1, 2)                                         # (B, 30, L)


# -----------------------------------------------------------------------------
# Parameter init matching the PyTorch module's initializers (shapes = PyTorch)
# -----------------------------------------------------------------------------
def init_params(key, ndim=NDIM, rank=RANK):
    ks = jax.random.split(key, 10)
    f32 = jnp.float32
    return dict(
        down_w=(jax.random.normal(ks[0], (rank, ndim), f32) * (1.0 / rank)),
        down_b=jax.random.normal(ks[1], (rank,), f32) * 0.02,
        up_w=jnp.zeros((ndim, rank), f32),
        up_b=jax.random.normal(ks[2], (ndim,), f32) * 0.02,
        conv_w=jax.random.normal(ks[3], (HID, ndim, 1), f32) * (1.0 / math.sqrt(ndim)),
        q_w=jax.random.normal(ks[4], (HID, HID), f32) * (1.0 / math.sqrt(HID)),
        q_b=jax.random.normal(ks[5], (HID,), f32) * 0.02,
        k_w=jax.random.normal(ks[6], (HID, HID), f32) * (1.0 / math.sqrt(HID)),
        k_b=jax.random.normal(ks[7], (HID,), f32) * 0.02,
        v_w=jax.random.normal(ks[8], (HID, HID), f32) * (1.0 / math.sqrt(HID)),
        v_b=jax.random.normal(ks[9], (HID,), f32) * 0.02,
        ln_gamma=jnp.ones((HID,), f32),
        ln_beta=jnp.zeros((HID,), f32),
    )


if __name__ == "__main__":
    key = jax.random.PRNGKey(0)
    kx, kc, kp = jax.random.split(key, 3)
    B, L, Lc = 2, 8, 8
    x = jax.random.normal(kx, (B, NDIM, L), jnp.float32)          # PyTorch `input`  (B, ndim, L)
    context = jax.random.normal(kc, (B, Lc, NDIM), jnp.float32)   # PyTorch `context` (B, Lc, ndim)
    params = init_params(kp)

    out = context_gate_early_adaptor(x, context, params)
    out = jax.block_until_ready(out)
    assert out.shape == (B, HID, L), out.shape
    assert bool(jnp.all(jnp.isfinite(out)))

    ref = jax.block_until_ready(_reference(x, context, params))
    err = float(jnp.max(jnp.abs(out - ref)))
    assert err < 3e-2, f"max abs error vs reference: {err}"
    print("KERNEL_OK")
</pallas_src>

<mosaic_0001>
module attributes {stable_mosaic.version = 11 : i64} {
  func.func @_fused_kernel(%arg0: i32, %arg1: i32, %arg2: memref<1x16x8xf32, #tpu.memory_space<vmem>>, %arg3: memref<1x16x8xf32, #tpu.memory_space<vmem>>, %arg4: memref<8x16xf32, #tpu.memory_space<vmem>>, %arg5: memref<8x1xf32, #tpu.memory_space<vmem>>, %arg6: memref<16x8xf32, #tpu.memory_space<vmem>>, %arg7: memref<16x1xf32, #tpu.memory_space<vmem>>, %arg8: memref<30x16xf32, #tpu.memory_space<vmem>>, %arg9: memref<5x6x30xf32, #tpu.memory_space<vmem>>, %arg10: memref<5x6x1xf32, #tpu.memory_space<vmem>>, %arg11: memref<5x30x6xf32, #tpu.memory_space<vmem>>, %arg12: memref<5x1x6xf32, #tpu.memory_space<vmem>>, %arg13: memref<5x6x30xf32, #tpu.memory_space<vmem>>, %arg14: memref<5x6x1xf32, #tpu.memory_space<vmem>>, %arg15: memref<30x1xf32, #tpu.memory_space<vmem>>, %arg16: memref<30x1xf32, #tpu.memory_space<vmem>>, %arg17: memref<1x30x8xf32, #tpu.memory_space<vmem>>, %arg18: memref<5x8x6xbf16, #tpu.memory_space<vmem>>, %arg19: memref<5x7x8xbf16, #tpu.memory_space<vmem>>, %arg20: memref<30x8xf32, #tpu.memory_space<vmem>>) attributes {dimension_semantics = [#tpu.dimension_semantics<parallel>, #tpu.dimension_semantics<arbitrary>], iteration_bounds = array<i64: 2, 1>, scalar_prefetch = 0 : i64, scratch_operands = 3 : i64, tpu.core_type = #tpu.core_type<tc>, window_params = [{transform_indices = @transform_0, window_bounds = array<i64: 1, 16, 8>}, {transform_indices = @transform_1, window_bounds = array<i64: 1, 16, 8>}, {pipeline_mode = #tpu.pipeline_mode<synchronous>, transform_indices = @transform_2, window_bounds = array<i64: 8, 16>}, {pipeline_mode = #tpu.pipeline_mode<synchronous>, transform_indices = @transform_3, window_bounds = array<i64: 8, 1>}, {pipeline_mode = #tpu.pipeline_mode<synchronous>, transform_indices = @transform_4, window_bounds = array<i64: 16, 8>}, {pipeline_mode = #tpu.pipeline_mode<synchronous>, transform_indices = @transform_5, window_bounds = array<i64: 16, 1>}, {pipeline_mode = #tpu.pipeline_mode<synchronous>, transform_indices = @transform_6, window_bounds = array<i64: 30, 16>}, {pipeline_mode = #tpu.pipeline_mode<synchronous>, transform_indices = @transform_7, window_bounds = array<i64: 5, 6, 30>}, {pipeline_mode = #tpu.pipeline_mode<synchronous>, transform_indices = @transform_8, window_bounds = array<i64: 5, 6, 1>}, {pipeline_mode = #tpu.pipeline_mode<synchronous>, transform_indices = @transform_9, window_bounds = array<i64: 5, 30, 6>}, {pipeline_mode = #tpu.pipeline_mode<synchronous>, transform_indices = @transform_10, window_bounds = array<i64: 5, 1, 6>}, {pipeline_mode = #tpu.pipeline_mode<synchronous>, transform_indices = @transform_11, window_bounds = array<i64: 5, 6, 30>}, {pipeline_mode = #tpu.pipeline_mode<synchronous>, transform_indices = @transform_12, window_bounds = array<i64: 5, 6, 1>}, {pipeline_mode = #tpu.pipeline_mode<synchronous>, transform_indices = @transform_13, window_bounds = array<i64: 30, 1>}, {pipeline_mode = #tpu.pipeline_mode<synchronous>, transform_indices = @transform_14, window_bounds = array<i64: 30, 1>}, {transform_indices = @transform_15, window_bounds = array<i64: 1, 30, 8>}]} {
    %c0_i32 = arith.constant 0 : i32
    %0 = arith.cmpi eq, %arg1, %c0_i32 : i32
    %1 = arith.extui %0 : i1 to i32
    %c0_i32_0 = arith.constant 0 : i32
    %2 = arith.cmpi ne, %1, %c0_i32_0 : i32
    scf.if %2 {
      %c0_117 = arith.constant 0 : index
      %c0_118 = arith.constant 0 : index
      %c0_119 = arith.constant 0 : index
      %194 = vector.load %arg3[%c0_117, %c0_118, %c0_119] : memref<1x16x8xf32, #tpu.memory_space<vmem>>, vector<1x16x8xf32>
      %195 = vector.shape_cast %194 : vector<1x16x8xf32> to vector<16x8xf32>
      %c0_120 = arith.constant 0 : index
      %c0_121 = arith.constant 0 : index
      %196 = vector.load %arg4[%c0_120, %c0_121] : memref<8x16xf32, #tpu.memory_space<vmem>>, vector<8x16xf32>
      %cst_122 = arith.constant dense<0.000000e+00> : vector<8x8xf32>
      %197 = tpu.matmul %196, %195, %cst_122 {dimension_numbers = #tpu.dot_dimension_numbers<[1], [0], [0], [1], [0, 0, 1, 1], [], []>} : vector<8x16xf32>, vector<16x8xf32>, vector<8x8xf32> -> vector<8x8xf32>
      %c0_123 = arith.constant 0 : index
      %c0_124 = arith.constant 0 : index
      %198 = vector.load %arg5[%c0_123, %c0_124] : memref<8x1xf32, #tpu.memory_space<vmem>>, vector<8x1xf32>
      %199 = vector.broadcast %198 : vector<8x1xf32> to vector<8x8xf32>
      %200 = arith.addf %197, %199 : vector<8x8xf32>
      %c0_125 = arith.constant 0 : index
      %c0_126 = arith.constant 0 : index
      %201 = vector.load %arg6[%c0_125, %c0_126] : memref<16x8xf32, #tpu.memory_space<vmem>>, vector<16x8xf32>
      %cst_127 = arith.constant dense<0.000000e+00> : vector<16x8xf32>
      %202 = tpu.matmul %201, %200, %cst_127 {dimension_numbers = #tpu.dot_dimension_numbers<[1], [0], [0], [1], [0, 0, 1, 1], [], []>} : vector<16x8xf32>, vector<8x8xf32>, vector<16x8xf32> -> vector<16x8xf32>
      %c0_128 = arith.constant 0 : index
      %c0_129 = arith.constant 0 : index
      %203 = vector.load %arg7[%c0_128, %c0_129] : memref<16x1xf32, #tpu.memory_space<vmem>>, vector<16x1xf32>
      %204 = vector.broadcast %203 : vector<16x1xf32> to vector<16x8xf32>
      %205 = arith.addf %202, %204 : vector<16x8xf32>
      %c0_130 = arith.constant 0 : index
      %c0_131 = arith.constant 0 : index
      %206 = vector.load %arg8[%c0_130, %c0_131] : memref<30x16xf32, #tpu.memory_space<vmem>>, vector<30x16xf32>
      %207 = arith.addf %205, %195 : vector<16x8xf32>
      %cst_132 = arith.constant dense<0.000000e+00> : vector<30x8xf32>
      %208 = tpu.matmul %206, %207, %cst_132 {dimension_numbers = #tpu.dot_dimension_numbers<[1], [0], [0], [1], [0, 0, 1, 1], [], []>} : vector<30x16xf32>, vector<16x8xf32>, vector<30x8xf32> -> vector<30x8xf32>
      %cst_133 = arith.constant 1.000000e+00 : bf16
      %209 = vector.broadcast %cst_133 : bf16 to vector<1x8xbf16>
      %c0_134 = arith.constant 0 : index
      %c0_135 = arith.constant 0 : index
      %c0_136 = arith.constant 0 : index
      %210 = vector.load %arg11[%c0_134, %c0_135, %c0_136] : memref<5x30x6xf32, #tpu.memory_space<vmem>>, vector<1x30x6xf32>
      %211 = vector.shape_cast %210 : vector<1x30x6xf32> to vector<30x6xf32>
      %cst_137 = arith.constant dense<0.000000e+00> : vector<8x6xf32>
      %212 = tpu.matmul %208, %211, %cst_137 {dimension_numbers = #tpu.dot_dimension_numbers<[0], [0], [1], [1], [0, 1, 1, 1], [], []>} : vector<30x8xf32>, vector<30x6xf32>, vector<8x6xf32> -> vector<8x6xf32>
      %c0_138 = arith.constant 0 : index
      %c0_139 = arith.constant 0 : index
      %c0_140 = arith.constant 0 : index
      %213 = vector.load %arg12[%c0_138, %c0_139, %c0_140] : memref<5x1x6xf32, #tpu.memory_space<vmem>>, vector<1x1x6xf32>
      %214 = vector.shape_cast %213 : vector<1x1x6xf32> to vector<1x6xf32>
      %215 = vector.broadcast %214 : vector<1x6xf32> to vector<8x6xf32>
      %216 = arith.addf %212, %215 : vector<8x6xf32>
      %217 = arith.truncf %216 : vector<8x6xf32> to vector<8x6xbf16>
      %c0_141 = arith.constant 0 : index
      %c0_142 = arith.constant 0 : index
      %c0_143 = arith.constant 0 : index
      %218 = vector.load %arg18[%c0_141, %c0_142, %c0_143] : memref<5x8x6xbf16, #tpu.memory_space<vmem>>, vector<1x8x6xbf16>
      %219 = vector.shape_cast %218 : vector<1x8x6xbf16> to vector<8x6xbf16>
      %220 = vector.shape_cast %217 : vector<8x6xbf16> to vector<1x8x6xbf16>
      tpu.vector_store %arg18[%c0_141, %c0_142, %c0_143], %220 {strides = array<i32>} : memref<5x8x6xbf16, #tpu.memory_space<vmem>>, vector<1x8x6xbf16>,
      %c0_144 = arith.constant 0 : index
      %c0_145 = arith.constant 0 : index
      %c0_146 = arith.constant 0 : index
      %221 = vector.load %arg13[%c0_144, %c0_145, %c0_146] : memref<5x6x30xf32, #tpu.memory_space<vmem>>, vector<1x6x30xf32>
      %222 = vector.shape_cast %221 : vector<1x6x30xf32> to vector<6x30xf32>
      %cst_147 = arith.constant dense<0.000000e+00> : vector<6x8xf32>
      %223 = tpu.matmul %222, %208, %cst_147 {dimension_numbers = #tpu.dot_dimension_numbers<[1], [0], [0], [1], [0, 0, 1, 1], [], []>} : vector<6x30xf32>, vector<30x8xf32>, vector<6x8xf32> -> vector<6x8xf32>
      %c0_148 = arith.constant 0 : index
      %c0_149 = arith.constant 0 : index
      %c0_150 = arith.constant 0 : index
      %224 = vector.load %arg14[%c0_148, %c0_149, %c0_150] : memref<5x6x1xf32, #tpu.memory_space<vmem>>, vector<1x6x1xf32>
      %225 = vector.shape_cast %224 : vector<1x6x1xf32> to vector<6x1xf32>
      %226 = vector.broadcast %225 : vector<6x1xf32> to vector<6x8xf32>
      %227 = arith.addf %223, %226 : vector<6x8xf32>
      %228 = arith.truncf %227 : vector<6x8xf32> to vector<6x8xbf16>
      %c0_151 = arith.constant 0 : index
      %c0_152 = arith.constant 0 : index
      %c0_153 = arith.constant 0 : index
      %229 = vector.load %arg19[%c0_151, %c0_152, %c0_153] : memref<5x7x8xbf16, #tpu.memory_space<vmem>>, vector<1x6x8xbf16>
      %230 = vector.shape_cast %229 : vector<1x6x8xbf16> to vector<6x8xbf16>
      %231 = vector.shape_cast %228 : vector<6x8xbf16> to vector<1x6x8xbf16>
      tpu.vector_store %arg19[%c0_151, %c0_152, %c0_153], %231 {strides = array<i32>} : memref<5x7x8xbf16, #tpu.memory_space<vmem>>, vector<1x6x8xbf16>,
      %c0_154 = arith.constant 0 : index
      %c6_155 = arith.constant 6 : index
      %c0_156 = arith.constant 0 : index
      %232 = vector.load %arg19[%c0_154, %c6_155, %c0_156] : memref<5x7x8xbf16, #tpu.memory_space<vmem>>, vector<1x1x8xbf16>
      %233 = vector.shape_cast %232 : vector<1x1x8xbf16> to vector<1x8xbf16>
      %234 = vector.shape_cast %209 : vector<1x8xbf16> to vector<1x1x8xbf16>
      tpu.vector_store %arg19[%c0_154, %c6_155, %c0_156], %234 {strides = array<i32>} : memref<5x7x8xbf16, #tpu.memory_space<vmem>>, vector<1x1x8xbf16>,
      %c1_157 = arith.constant 1 : index
      %c0_158 = arith.constant 0 : index
      %c0_159 = arith.constant 0 : index
      %235 = vector.load %arg11[%c1_157, %c0_158, %c0_159] : memref<5x30x6xf32, #tpu.memory_space<vmem>>, vector<1x30x6xf32>
      %236 = vector.shape_cast %235 : vector<1x30x6xf32> to vector<30x6xf32>
      %cst_160 = arith.constant dense<0.000000e+00> : vector<8x6xf32>
      %237 = tpu.matmul %208, %236, %cst_160 {dimension_numbers = #tpu.dot_dimension_numbers<[0], [0], [1], [1], [0, 1, 1, 1], [], []>} : vector<30x8xf32>, vector<30x6xf32>, vector<8x6xf32> -> vector<8x6xf32>
      %c1_161 = arith.constant 1 : index
      %c0_162 = arith.constant 0 : index
      %c0_163 = arith.constant 0 : index
      %238 = vector.load %arg12[%c1_161, %c0_162, %c0_163] : memref<5x1x6xf32, #tpu.memory_space<vmem>>, vector<1x1x6xf32>
      %239 = vector.shape_cast %238 : vector<1x1x6xf32> to vector<1x6xf32>
      %240 = vector.broadcast %239 : vector<1x6xf32> to vector<8x6xf32>
      %241 = arith.addf %237, %240 : vector<8x6xf32>
      %242 = arith.truncf %241 : vector<8x6xf32> to vector<8x6xbf16>
      %c1_164 = arith.constant 1 : index
      %c0_165 = arith.constant 0 : index
      %c0_166 = arith.constant 0 : index
      %243 = vector.load %arg18[%c1_164, %c0_165, %c0_166] : memref<5x8x6xbf16, #tpu.memory_space<vmem>>, vector<1x8x6xbf16>
      %244 = vector.shape_cast %243 : vector<1x8x6xbf16> to vector<8x6xbf16>
      %245 = vector.shape_cast %242 : vector<8x6xbf16> to vector<1x8x6xbf16>
      tpu.vector_store %arg18[%c1_164, %c0_165, %c0_166], %245 {strides = array<i32>} : memref<5x8x6xbf16, #tpu.memory_space<vmem>>, vector<1x8x6xbf16>,
      %c1_167 = arith.constant 1 : index
      %c0_168 = arith.constant 0 : index
      %c0_169 = arith.constant 0 : index
      %246 = vector.load %arg13[%c1_167, %c0_168, %c0_169] : memref<5x6x30xf32, #tpu.memory_space<vmem>>, vector<1x6x30xf32>
      %247 = vector.shape_cast %246 : vector<1x6x30xf32> to vector<6x30xf32>
      %cst_170 = arith.constant dense<0.000000e+00> : vector<6x8xf32>
      %248 = tpu.matmul %247, %208, %cst_170 {dimension_numbers = #tpu.dot_dimension_numbers<[1], [0], [0], [1], [0, 0, 1, 1], [], []>} : vector<6x30xf32>, vector<30x8xf32>, vector<6x8xf32> -> vector<6x8xf32>
      %c1_171 = arith.constant 1 : index
      %c0_172 = arith.constant 0 : index
      %c0_173 = arith.constant 0 : index
      %249 = vector.load %arg14[%c1_171, %c0_172, %c0_173] : memref<5x6x1xf32, #tpu.memory_space<vmem>>, vector<1x6x1xf32>
      %250 = vector.shape_cast %249 : vector<1x6x1xf32> to vector<6x1xf32>
      %251 = vector.broadcast %250 : vector<6x1xf32> to vector<6x8xf32>
      %252 = arith.addf %248, %251 : vector<6x8xf32>
      %253 = arith.truncf %252 : vector<6x8xf32> to vector<6x8xbf16>
      %c1_174 = arith.constant 1 : index
      %c0_175 = arith.constant 0 : index
      %c0_176 = arith.constant 0 : index
      %254 = vector.load %arg19[%c1_174, %c0_175, %c0_176] : memref<5x7x8xbf16, #tpu.memory_space<vmem>>, vector<1x6x8xbf16>
      %255 = vector.shape_cast %254 : vector<1x6x8xbf16> to vector<6x8xbf16>
      %256 = vector.shape_cast %253 : vector<6x8xbf16> to vector<1x6x8xbf16>
      tpu.vector_store %arg19[%c1_174, %c0_175, %c0_176], %256 {strides = array<i32>} : memref<5x7x8xbf16, #tpu.memory_space<vmem>>, vector<1x6x8xbf16>,
      %c1_177 = arith.constant 1 : index
      %c6_178 = arith.constant 6 : index
      %c0_179 = arith.constant 0 : index
      %257 = vector.load %arg19[%c1_177, %c6_178, %c0_179] : memref<5x7x8xbf16, #tpu.memory_space<vmem>>, vector<1x1x8xbf16>
      %258 = vector.shape_cast %257 : vector<1x1x8xbf16> to vector<1x8xbf16>
      %259 = vector.shape_cast %209 : vector<1x8xbf16> to vector<1x1x8xbf16>
      tpu.vector_store %arg19[%c1_177, %c6_178, %c0_179], %259 {strides = array<i32>} : memref<5x7x8xbf16, #tpu.memory_space<vmem>>, vector<1x1x8xbf16>,
      %c2_180 = arith.constant 2 : index
      %c0_181 = arith.constant 0 : index
      %c0_182 = arith.constant 0 : index
      %260 = vector.load %arg11[%c2_180, %c0_181, %c0_182] : memref<5x30x6xf32, #tpu.memory_space<vmem>>, vector<1x30x6xf32>
      %261 = vector.shape_cast %260 : vector<1x30x6xf32> to vector<30x6xf32>
      %cst_183 = arith.constant dense<0.000000e+00> : vector<8x6xf32>
      %262 = tpu.matmul %208, %261, %cst_183 {dimension_numbers = #tpu.dot_dimension_numbers<[0], [0], [1], [1], [0, 1, 1, 1], [], []>} : vector<30x8xf32>, vector<30x6xf32>, vector<8x6xf32> -> vector<8x6xf32>
      %c2_184 = arith.constant 2 : index
      %c0_185 = arith.constant 0 : index
      %c0_186 = arith.constant 0 : index
      %263 = vector.load %arg12[%c2_184, %c0_185, %c0_186] : memref<5x1x6xf32, #tpu.memory_space<vmem>>, vector<1x1x6xf32>
      %264 = vector.shape_cast %263 : vector<1x1x6xf32> to vector<1x6xf32>
      %265 = vector.broadcast %264 : vector<1x6xf32> to vector<8x6xf32>
      %266 = arith.addf %262, %265 : vector<8x6xf32>
      %267 = arith.truncf %266 : vector<8x6xf32> to vector<8x6xbf16>
      %c2_187 = arith.constant 2 : index
      %c0_188 = arith.constant 0 : index
      %c0_189 = arith.constant 0 : index
      %268 = vector.load %arg18[%c2_187, %c0_188, %c0_189] : memref<5x8x6xbf16, #tpu.memory_space<vmem>>, vector<1x8x6xbf16>
      %269 = vector.shape_cast %268 : vector<1x8x6xbf16> to vector<8x6xbf16>
      %270 = vector.shape_cast %267 : vector<8x6xbf16> to vector<1x8x6xbf16>
      tpu.vector_store %arg18[%c2_187, %c0_188, %c0_189], %270 {strides = array<i32>} : memref<5x8x6xbf16, #tpu.memory_space<vmem>>, vector<1x8x6xbf16>,
      %c2_190 = arith.constant 2 : index
      %c0_191 = arith.constant 0 : index
      %c0_192 = arith.constant 0 : index
      %271 = vector.load %arg13[%c2_190, %c0_191, %c0_192] : memref<5x6x30xf32, #tpu.memory_space<vmem>>, vector<1x6x30xf32>
      %272 = vector.shape_cast %271 : vector<1x6x30xf32> to vector<6x30xf32>
      %cst_193 = arith.constant dense<0.000000e+00> : vector<6x8xf32>
      %273 = tpu.matmul %272, %208, %cst_193 {dimension_numbers = #tpu.dot_dimension_numbers<[1], [0], [0], [1], [0, 0, 1, 1], [], []>} : vector<6x30xf32>, vector<30x8xf32>, vector<6x8xf32> -> vector<6x8xf32>
      %c2_194 = arith.constant 2 : index
      %c0_195 = arith.constant 0 : index
      %c0_196 = arith.constant 0 : index
      %274 = vector.load %arg14[%c2_194, %c0_195, %c0_196] : memref<5x6x1xf32, #tpu.memory_space<vmem>>, vector<1x6x1xf32>
      %275 = vector.shape_cast %274 : vector<1x6x1xf32> to vector<6x1xf32>
      %276 = vector.broadcast %275 : vector<6x1xf32> to vector<6x8xf32>
      %277 = arith.addf %273, %276 : vector<6x8xf32>
      %278 = arith.truncf %277 : vector<6x8xf32> to vector<6x8xbf16>
      %c2_197 = arith.constant 2 : index
      %c0_198 = arith.constant 0 : index
      %c0_199 = arith.constant 0 : index
      %279 = vector.load %arg19[%c2_197, %c0_198, %c0_199] : memref<5x7x8xbf16, #tpu.memory_space<vmem>>, vector<1x6x8xbf16>
      %280 = vector.shape_cast %279 : vector<1x6x8xbf16> to vector<6x8xbf16>
      %281 = vector.shape_cast %278 : vector<6x8xbf16> to vector<1x6x8xbf16>
      tpu.vector_store %arg19[%c2_197, %c0_198, %c0_199], %281 {strides = array<i32>} : memref<5x7x8xbf16, #tpu.memory_space<vmem>>, vector<1x6x8xbf16>,
      %c2_200 = arith.constant 2 : index
      %c6_201 = arith.constant 6 : index
      %c0_202 = arith.constant 0 : index
      %282 = vector.load %arg19[%c2_200, %c6_201, %c0_202] : memref<5x7x8xbf16, #tpu.memory_space<vmem>>, vector<1x1x8xbf16>
      %283 = vector.shape_cast %282 : vector<1x1x8xbf16> to vector<1x8xbf16>
      %284 = vector.shape_cast %209 : vector<1x8xbf16> to vector<1x1x8xbf16>
      tpu.vector_store %arg19[%c2_200, %c6_201, %c0_202], %284 {strides = array<i32>} : memref<5x7x8xbf16, #tpu.memory_space<vmem>>, vector<1x1x8xbf16>,
      %c3_203 = arith.constant 3 : index
      %c0_204 = arith.constant 0 : index
      %c0_205 = arith.constant 0 : index
      %285 = vector.load %arg11[%c3_203, %c0_204, %c0_205] : memref<5x30x6xf32, #tpu.memory_space<vmem>>, vector<1x30x6xf32>
      %286 = vector.shape_cast %285 : vector<1x30x6xf32> to vector<30x6xf32>
      %cst_206 = arith.constant dense<0.000000e+00> : vector<8x6xf32>
      %287 = tpu.matmul %208, %286, %cst_206 {dimension_numbers = #tpu.dot_dimension_numbers<[0], [0], [1], [1], [0, 1, 1, 1], [], []>} : vector<30x8xf32>, vector<30x6xf32>, vector<8x6xf32> -> vector<8x6xf32>
      %c3_207 = arith.constant 3 : index
      %c0_208 = arith.constant 0 : index
      %c0_209 = arith.constant 0 : index
      %288 = vector.load %arg12[%c3_207, %c0_208, %c0_209] : memref<5x1x6xf32, #tpu.memory_space<vmem>>, vector<1x1x6xf32>
      %289 = vector.shape_cast %288 : vector<1x1x6xf32> to vector<1x6xf32>
      %290 = vector.broadcast %289 : vector<1x6xf32> to vector<8x6xf32>
      %291 = arith.addf %287, %290 : vector<8x6xf32>
      %292 = arith.truncf %291 : vector<8x6xf32> to vector<8x6xbf16>
      %c3_210 = arith.constant 3 : index
      %c0_211 = arith.constant 0 : index
      %c0_212 = arith.constant 0 : index
      %293 = vector.load %arg18[%c3_210, %c0_211, %c0_212] : memref<5x8x6xbf16, #tpu.memory_space<vmem>>, vector<1x8x6xbf16>
      %294 = vector.shape_cast %293 : vector<1x8x6xbf16> to vector<8x6xbf16>
      %295 = vector.shape_cast %292 : vector<8x6xbf16> to vector<1x8x6xbf16>
      tpu.vector_store %arg18[%c3_210, %c0_211, %c0_212], %295 {strides = array<i32>} : memref<5x8x6xbf16, #tpu.memory_space<vmem>>, vector<1x8x6xbf16>,
      %c3_213 = arith.constant 3 : index
      %c0_214 = arith.constant 0 : index
      %c0_215 = arith.constant 0 : index
      %296 = vector.load %arg13[%c3_213, %c0_214, %c0_215] : memref<5x6x30xf32, #tpu.memory_space<vmem>>, vector<1x6x30xf32>
      %297 = vector.shape_cast %296 : vector<1x6x30xf32> to vector<6x30xf32>
      %cst_216 = arith.constant dense<0.000000e+00> : vector<6x8xf32>
      %298 = tpu.matmul %297, %208, %cst_216 {dimension_numbers = #tpu.dot_dimension_numbers<[1], [0], [0], [1], [0, 0, 1, 1], [], []>} : vector<6x30xf32>, vector<30x8xf32>, vector<6x8xf32> -> vector<6x8xf32>
      %c3_217 = arith.constant 3 : index
      %c0_218 = arith.constant 0 : index
      %c0_219 = arith.constant 0 : index
      %299 = vector.load %arg14[%c3_217, %c0_218, %c0_219] : memref<5x6x1xf32, #tpu.memory_space<vmem>>, vector<1x6x1xf32>
      %300 = vector.shape_cast %299 : vector<1x6x1xf32> to vector<6x1xf32>
      %301 = vector.broadcast %300 : vector<6x1xf32> to vector<6x8xf32>
      %302 = arith.addf %298, %301 : vector<6x8xf32>
      %303 = arith.truncf %302 : vector<6x8xf32> to vector<6x8xbf16>
      %c3_220 = arith.constant 3 : index
      %c0_221 = arith.constant 0 : index
      %c0_222 = arith.constant 0 : index
      %304 = vector.load %arg19[%c3_220, %c0_221, %c0_222] : memref<5x7x8xbf16, #tpu.memory_space<vmem>>, vector<1x6x8xbf16>
      %305 = vector.shape_cast %304 : vector<1x6x8xbf16> to vector<6x8xbf16>
      %306 = vector.shape_cast %303 : vector<6x8xbf16> to vector<1x6x8xbf16>
      tpu.vector_store %arg19[%c3_220, %c0_221, %c0_222], %306 {strides = array<i32>} : memref<5x7x8xbf16, #tpu.memory_space<vmem>>, vector<1x6x8xbf16>,
      %c3_223 = arith.constant 3 : index
      %c6_224 = arith.constant 6 : index
      %c0_225 = arith.constant 0 : index
      %307 = vector.load %arg19[%c3_223, %c6_224, %c0_225] : memref<5x7x8xbf16, #tpu.memory_space<vmem>>, vector<1x1x8xbf16>
      %308 = vector.shape_cast %307 : vector<1x1x8xbf16> to vector<1x8xbf16>
      %309 = vector.shape_cast %209 : vector<1x8xbf16> to vector<1x1x8xbf16>
      tpu.vector_store %arg19[%c3_223, %c6_224, %c0_225], %309 {strides = array<i32>} : memref<5x7x8xbf16, #tpu.memory_space<vmem>>, vector<1x1x8xbf16>,
      %c4_226 = arith.constant 4 : index
      %c0_227 = arith.constant 0 : index
      %c0_228 = arith.constant 0 : index
      %310 = vector.load %arg11[%c4_226, %c0_227, %c0_228] : memref<5x30x6xf32, #tpu.memory_space<vmem>>, vector<1x30x6xf32>
      %311 = vector.shape_cast %310 : vector<1x30x6xf32> to vector<30x6xf32>
      %cst_229 = arith.constant dense<0.000000e+00> : vector<8x6xf32>
      %312 = tpu.matmul %208, %311, %cst_229 {dimension_numbers = #tpu.dot_dimension_numbers<[0], [0], [1], [1], [0, 1, 1, 1], [], []>} : vector<30x8xf32>, vector<30x6xf32>, vector<8x6xf32> -> vector<8x6xf32>
      %c4_230 = arith.constant 4 : index
      %c0_231 = arith.constant 0 : index
      %c0_232 = arith.constant 0 : index
      %313 = vector.load %arg12[%c4_230, %c0_231, %c0_232] : memref<5x1x6xf32, #tpu.memory_space<vmem>>, vector<1x1x6xf32>
      %314 = vector.shape_cast %313 : vector<1x1x6xf32> to vector<1x6xf32>
      %315 = vector.broadcast %314 : vector<1x6xf32> to vector<8x6xf32>
      %316 = arith.addf %312, %315 : vector<8x6xf32>
      %317 = arith.truncf %316 : vector<8x6xf32> to vector<8x6xbf16>
      %c4_233 = arith.constant 4 : index
      %c0_234 = arith.constant 0 : index
      %c0_235 = arith.constant 0 : index
      %318 = vector.load %arg18[%c4_233, %c0_234, %c0_235] : memref<5x8x6xbf16, #tpu.memory_space<vmem>>, vector<1x8x6xbf16>
      %319 = vector.shape_cast %318 : vector<1x8x6xbf16> to vector<8x6xbf16>
      %320 = vector.shape_cast %317 : vector<8x6xbf16> to vector<1x8x6xbf16>
      tpu.vector_store %arg18[%c4_233, %c0_234, %c0_235], %320 {strides = array<i32>} : memref<5x8x6xbf16, #tpu.memory_space<vmem>>, vector<1x8x6xbf16>,
      %c4_236 = arith.constant 4 : index
      %c0_237 = arith.constant 0 : index
      %c0_238 = arith.constant 0 : index
      %321 = vector.load %arg13[%c4_236, %c0_237, %c0_238] : memref<5x6x30xf32, #tpu.memory_space<vmem>>, vector<1x6x30xf32>
      %322 = vector.shape_cast %321 : vector<1x6x30xf32> to vector<6x30xf32>
      %cst_239 = arith.constant dense<0.000000e+00> : vector<6x8xf32>
      %323 = tpu.matmul %322, %208, %cst_239 {dimension_numbers = #tpu.dot_dimension_numbers<[1], [0], [0], [1], [0, 0, 1, 1], [], []>} : vector<6x30xf32>, vector<30x8xf32>, vector<6x8xf32> -> vector<6x8xf32>
      %c4_240 = arith.constant 4 : index
      %c0_241 = arith.constant 0 : index
      %c0_242 = arith.constant 0 : index
      %324 = vector.load %arg14[%c4_240, %c0_241, %c0_242] : memref<5x6x1xf32, #tpu.memory_space<vmem>>, vector<1x6x1xf32>
      %325 = vector.shape_cast %324 : vector<1x6x1xf32> to vector<6x1xf32>
      %326 = vector.broadcast %325 : vector<6x1xf32> to vector<6x8xf32>
      %327 = arith.addf %323, %326 : vector<6x8xf32>
      %328 = arith.truncf %327 : vector<6x8xf32> to vector<6x8xbf16>
      %c4_243 = arith.constant 4 : index
      %c0_244 = arith.constant 0 : index
      %c0_245 = arith.constant 0 : index
      %329 = vector.load %arg19[%c4_243, %c0_244, %c0_245] : memref<5x7x8xbf16, #tpu.memory_space<vmem>>, vector<1x6x8xbf16>
      %330 = vector.shape_cast %329 : vector<1x6x8xbf16> to vector<6x8xbf16>
      %331 = vector.shape_cast %328 : vector<6x8xbf16> to vector<1x6x8xbf16>
      tpu.vector_store %arg19[%c4_243, %c0_244, %c0_245], %331 {strides = array<i32>} : memref<5x7x8xbf16, #tpu.memory_space<vmem>>, vector<1x6x8xbf16>,
      %c4_246 = arith.constant 4 : index
      %c6_247 = arith.constant 6 : index
      %c0_248 = arith.constant 0 : index
      %332 = vector.load %arg19[%c4_246, %c6_247, %c0_248] : memref<5x7x8xbf16, #tpu.memory_space<vmem>>, vector<1x1x8xbf16>
      %333 = vector.shape_cast %332 : vector<1x1x8xbf16> to vector<1x8xbf16>
      %334 = vector.shape_cast %209 : vector<1x8xbf16> to vector<1x1x8xbf16>
      tpu.vector_store %arg19[%c4_246, %c6_247, %c0_248], %334 {strides = array<i32>} : memref<5x7x8xbf16, #tpu.memory_space<vmem>>, vector<1x1x8xbf16>,
    } else {
    }
    %c0 = arith.constant 0 : index
    %c0_1 = arith.constant 0 : index
    %c0_2 = arith.constant 0 : index
    %3 = vector.load %arg2[%c0, %c0_1, %c0_2] : memref<1x16x8xf32, #tpu.memory_space<vmem>>, vector<1x16x8xf32>
    %4 = vector.shape_cast %3 : vector<1x16x8xf32> to vector<16x8xf32>
    %c0_3 = arith.constant 0 : index
    %c0_4 = arith.constant 0 : index
    %5 = vector.load %arg4[%c0_3, %c0_4] : memref<8x16xf32, #tpu.memory_space<vmem>>, vector<8x16xf32>
    %cst = arith.constant dense<0.000000e+00> : vector<8x8xf32>
    %6 = tpu.matmul %5, %4, %cst {dimension_numbers = #tpu.dot_dimension_numbers<[1], [0], [0], [1], [0, 0, 1, 1], [], []>} : vector<8x16xf32>, vector<16x8xf32>, vector<8x8xf32> -> vector<8x8xf32>
    %c0_5 = arith.constant 0 : index
    %c0_6 = arith.constant 0 : index
    %7 = vector.load %arg5[%c0_5, %c0_6] : memref<8x1xf32, #tpu.memory_space<vmem>>, vector<8x1xf32>
    %8 = vector.broadcast %7 : vector<8x1xf32> to vector<8x8xf32>
    %9 = arith.addf %6, %8 : vector<8x8xf32>
    %c0_7 = arith.constant 0 : index
    %c0_8 = arith.constant 0 : index
    %10 = vector.load %arg6[%c0_7, %c0_8] : memref<16x8xf32, #tpu.memory_space<vmem>>, vector<16x8xf32>
    %cst_9 = arith.constant dense<0.000000e+00> : vector<16x8xf32>
    %11 = tpu.matmul %10, %9, %cst_9 {dimension_numbers = #tpu.dot_dimension_numbers<[1], [0], [0], [1], [0, 0, 1, 1], [], []>} : vector<16x8xf32>, vector<8x8xf32>, vector<16x8xf32> -> vector<16x8xf32>
    %c0_10 = arith.constant 0 : index
    %c0_11 = arith.constant 0 : index
    %12 = vector.load %arg7[%c0_10, %c0_11] : memref<16x1xf32, #tpu.memory_space<vmem>>, vector<16x1xf32>
    %13 = vector.broadcast %12 : vector<16x1xf32> to vector<16x8xf32>
    %14 = arith.addf %11, %13 : vector<16x8xf32>
    %c0_12 = arith.constant 0 : index
    %c0_13 = arith.constant 0 : index
    %15 = vector.load %arg8[%c0_12, %c0_13] : memref<30x16xf32, #tpu.memory_space<vmem>>, vector<30x16xf32>
    %16 = arith.addf %14, %4 : vector<16x8xf32>
    %cst_14 = arith.constant dense<0.000000e+00> : vector<30x8xf32>
    %17 = tpu.matmul %15, %16, %cst_14 {dimension_numbers = #tpu.dot_dimension_numbers<[1], [0], [0], [1], [0, 0, 1, 1], [], []>} : vector<30x16xf32>, vector<16x8xf32>, vector<30x8xf32> -> vector<30x8xf32>
    %c0_15 = arith.constant 0 : index
    %c0_16 = arith.constant 0 : index
    %c0_17 = arith.constant 0 : index
    %18 = vector.load %arg9[%c0_15, %c0_16, %c0_17] : memref<5x6x30xf32, #tpu.memory_space<vmem>>, vector<1x6x30xf32>
    %19 = vector.shape_cast %18 : vector<1x6x30xf32> to vector<6x30xf32>
    %cst_18 = arith.constant dense<0.000000e+00> : vector<6x8xf32>
    %20 = tpu.matmul %19, %17, %cst_18 {dimension_numbers = #tpu.dot_dimension_numbers<[1], [0], [0], [1], [0, 0, 1, 1], [], []>} : vector<6x30xf32>, vector<30x8xf32>, vector<6x8xf32> -> vector<6x8xf32>
    %c0_19 = arith.constant 0 : index
    %c0_20 = arith.constant 0 : index
    %c0_21 = arith.constant 0 : index
    %21 = vector.load %arg10[%c0_19, %c0_20, %c0_21] : memref<5x6x1xf32, #tpu.memory_space<vmem>>, vector<1x6x1xf32>
    %22 = vector.shape_cast %21 : vector<1x6x1xf32> to vector<6x1xf32>
    %23 = vector.broadcast %22 : vector<6x1xf32> to vector<6x8xf32>
    %24 = arith.addf %20, %23 : vector<6x8xf32>
    %25 = arith.truncf %24 : vector<6x8xf32> to vector<6x8xbf16>
    %c0_22 = arith.constant 0 : index
    %c0_23 = arith.constant 0 : index
    %c0_24 = arith.constant 0 : index
    %26 = vector.load %arg18[%c0_22, %c0_23, %c0_24] : memref<5x8x6xbf16, #tpu.memory_space<vmem>>, vector<1x8x6xbf16>
    %27 = vector.shape_cast %26 : vector<1x8x6xbf16> to vector<8x6xbf16>
    %cst_25 = arith.constant dense<0.000000e+00> : vector<8x8xf32>
    %28 = tpu.matmul %27, %25, %cst_25 {dimension_numbers = #tpu.dot_dimension_numbers<[1], [0], [0], [1], [0, 0, 1, 1], [], []>} : vector<8x6xbf16>, vector<6x8xbf16>, vector<8x8xf32> -> vector<8x8xf32>
    %cst_26 = arith.constant dense<0xFF800000> : vector<8xf32>
    %29 = vector.multi_reduction <maximumf>, %28, %cst_26 [0] : vector<8x8xf32> to vector<8xf32>
    %30 = vector.shape_cast %29 : vector<8xf32> to vector<1x8xf32>
    %31 = vector.broadcast %30 : vector<1x8xf32> to vector<8x8xf32>
    %32 = arith.subf %28, %31 : vector<8x8xf32>
    %33 = math.exp %32 : vector<8x8xf32>
    %34 = arith.truncf %33 : vector<8x8xf32> to vector<8x8xbf16>
    %c0_27 = arith.constant 0 : index
    %c0_28 = arith.constant 0 : index
    %c0_29 = arith.constant 0 : index
    %35 = vector.load %arg19[%c0_27, %c0_28, %c0_29] : memref<5x7x8xbf16, #tpu.memory_space<vmem>>, vector<1x7x8xbf16>
    %36 = vector.shape_cast %35 : vector<1x7x8xbf16> to vector<7x8xbf16>
    %cst_30 = arith.constant dense<0.000000e+00> : vector<7x8xf32>
    %37 = tpu.matmul %36, %34, %cst_30 {dimension_numbers = #tpu.dot_dimension_numbers<[1], [0], [0], [1], [0, 0, 1, 1], [], []>} : vector<7x8xbf16>, vector<8x8xbf16>, vector<7x8xf32> -> vector<7x8xf32>
    %38 = vector.extract_strided_slice %37 {offsets = [6, 0], sizes = [1, 8], strides = [1, 1]} : vector<7x8xf32> to vector<1x8xf32>
    %39 = tpu.reciprocal %38 {approx = true} : vector<1x8xf32> -> vector<1x8xf32>
    %40 = vector.extract_strided_slice %37 {offsets = [0, 0], sizes = [6, 8], strides = [1, 1]} : vector<7x8xf32> to vector<6x8xf32>
    %41 = vector.broadcast %39 : vector<1x8xf32> to vector<6x8xf32>
    %42 = arith.mulf %40, %41 : vector<6x8xf32>
    %c0_31 = arith.constant 0 : index
    %c0_32 = arith.constant 0 : index
    %43 = vector.load %arg20[%c0_31, %c0_32] : memref<30x8xf32, #tpu.memory_space<vmem>>, vector<6x8xf32>
    tpu.vector_store %arg20[%c0_31, %c0_32], %42 {strides = array<i32>} : memref<30x8xf32, #tpu.memory_space<vmem>>, vector<6x8xf32>,
    %c1 = arith.constant 1 : index
    %c0_33 = arith.constant 0 : index
    %c0_34 = arith.constant 0 : index
    %44 = vector.load %arg9[%c1, %c0_33, %c0_34] : memref<5x6x30xf32, #tpu.memory_space<vmem>>, vector<1x6x30xf32>
    %45 = vector.shape_cast %44 : vector<1x6x30xf32> to vector<6x30xf32>
    %cst_35 = arith.constant dense<0.000000e+00> : vector<6x8xf32>
    %46 = tpu.matmul %45, %17, %cst_35 {dimension_numbers = #tpu.dot_dimension_numbers<[1], [0], [0], [1], [0, 0, 1, 1], [], []>} : vector<6x30xf32>, vector<30x8xf32>, vector<6x8xf32> -> vector<6x8xf32>
    %c1_36 = arith.constant 1 : index
    %c0_37 = arith.constant 0 : index
    %c0_38 = arith.constant 0 : index
    %47 = vector.load %arg10[%c1_36, %c0_37, %c0_38] : memref<5x6x1xf32, #tpu.memory_space<vmem>>, vector<1x6x1xf32>
    %48 = vector.shape_cast %47 : vector<1x6x1xf32> to vector<6x1xf32>
    %49 = vector.broadcast %48 : vector<6x1xf32> to vector<6x8xf32>
    %50 = arith.addf %46, %49 : vector<6x8xf32>
    %51 = arith.truncf %50 : vector<6x8xf32> to vector<6x8xbf16>
    %c1_39 = arith.constant 1 : index
    %c0_40 = arith.constant 0 : index
    %c0_41 = arith.constant 0 : index
    %52 = vector.load %arg18[%c1_39, %c0_40, %c0_41] : memref<5x8x6xbf16, #tpu.memory_space<vmem>>, vector<1x8x6xbf16>
    %53 = vector.shape_cast %52 : vector<1x8x6xbf16> to vector<8x6xbf16>
    %cst_42 = arith.constant dense<0.000000e+00> : vector<8x8xf32>
    %54 = tpu.matmul %53, %51, %cst_42 {dimension_numbers = #tpu.dot_dimension_numbers<[1], [0], [0], [1], [0, 0, 1, 1], [], []>} : vector<8x6xbf16>, vector<6x8xbf16>, vector<8x8xf32> -> vector<8x8xf32>
    %cst_43 = arith.constant dense<0xFF800000> : vector<8xf32>
    %55 = vector.multi_reduction <maximumf>, %54, %cst_43 [0] : vector<8x8xf32> to vector<8xf32>
    %56 = vector.shape_cast %55 : vector<8xf32> to vector<1x8xf32>
    %57 = vector.broadcast %56 : vector<1x8xf32> to vector<8x8xf32>
    %58 = arith.subf %54, %57 : vector<8x8xf32>
    %59 = math.exp %58 : vector<8x8xf32>
    %60 = arith.truncf %59 : vector<8x8xf32> to vector<8x8xbf16>
    %c1_44 = arith.constant 1 : index
    %c0_45 = arith.constant 0 : index
    %c0_46 = arith.constant 0 : index
    %61 = vector.load %arg19[%c1_44, %c0_45, %c0_46] : memref<5x7x8xbf16, #tpu.memory_space<vmem>>, vector<1x7x8xbf16>
    %62 = vector.shape_cast %61 : vector<1x7x8xbf16> to vector<7x8xbf16>
    %cst_47 = arith.constant dense<0.000000e+00> : vector<7x8xf32>
    %63 = tpu.matmul %62, %60, %cst_47 {dimension_numbers = #tpu.dot_dimension_numbers<[1], [0], [0], [1], [0, 0, 1, 1], [], []>} : vector<7x8xbf16>, vector<8x8xbf16>, vector<7x8xf32> -> vector<7x8xf32>
    %64 = vector.extract_strided_slice %63 {offsets = [6, 0], sizes = [1, 8], strides = [1, 1]} : vector<7x8xf32> to vector<1x8xf32>
    %65 = tpu.reciprocal %64 {approx = true} : vector<1x8xf32> -> vector<1x8xf32>
    %66 = vector.extract_strided_slice %63 {offsets = [0, 0], sizes = [6, 8], strides = [1, 1]} : vector<7x8xf32> to vector<6x8xf32>
    %67 = vector.broadcast %65 : vector<1x8xf32> to vector<6x8xf32>
    %68 = arith.mulf %66, %67 : vector<6x8xf32>
    %c6 = arith.constant 6 : index
    %c0_48 = arith.constant 0 : index
    %69 = vector.load %arg20[%c6, %c0_48] : memref<30x8xf32, #tpu.memory_space<vmem>>, vector<6x8xf32>
    tpu.vector_store %arg20[%c6, %c0_48], %68 {strides = array<i32>} : memref<30x8xf32, #tpu.memory_space<vmem>>, vector<6x8xf32>,
    %c2 = arith.constant 2 : index
    %c0_49 = arith.constant 0 : index
    %c0_50 = arith.constant 0 : index
    %70 = vector.load %arg9[%c2, %c0_49, %c0_50] : memref<5x6x30xf32, #tpu.memory_space<vmem>>, vector<1x6x30xf32>
    %71 = vector.shape_cast %70 : vector<1x6x30xf32> to vector<6x30xf32>
    %cst_51 = arith.constant dense<0.000000e+00> : vector<6x8xf32>
    %72 = tpu.matmul %71, %17, %cst_51 {dimension_numbers = #tpu.dot_dimension_numbers<[1], [0], [0], [1], [0, 0, 1, 1], [], []>} : vector<6x30xf32>, vector<30x8xf32>, vector<6x8xf32> -> vector<6x8xf32>
    %c2_52 = arith.constant 2 : index
    %c0_53 = arith.constant 0 : index
    %c0_54 = arith.constant 0 : index
    %73 = vector.load %arg10[%c2_52, %c0_53, %c0_54] : memref<5x6x1xf32, #tpu.memory_space<vmem>>, vector<1x6x1xf32>
    %74 = vector.shape_cast %73 : vector<1x6x1xf32> to vector<6x1xf32>
    %75 = vector.broadcast %74 : vector<6x1xf32> to vector<6x8xf32>
    %76 = arith.addf %72, %75 : vector<6x8xf32>
    %77 = arith.truncf %76 : vector<6x8xf32> to vector<6x8xbf16>
    %c2_55 = arith.constant 2 : index
    %c0_56 = arith.constant 0 : index
    %c0_57 = arith.constant 0 : index
    %78 = vector.load %arg18[%c2_55, %c0_56, %c0_57] : memref<5x8x6xbf16, #tpu.memory_space<vmem>>, vector<1x8x6xbf16>
    %79 = vector.shape_cast %78 : vector<1x8x6xbf16> to vector<8x6xbf16>
    %cst_58 = arith.constant dense<0.000000e+00> : vector<8x8xf32>
    %80 = tpu.matmul %79, %77, %cst_58 {dimension_numbers = #tpu.dot_dimension_numbers<[1], [0], [0], [1], [0, 0, 1, 1], [], []>} : vector<8x6xbf16>, vector<6x8xbf16>, vector<8x8xf32> -> vector<8x8xf32>
    %cst_59 = arith.constant dense<0xFF800000> : vector<8xf32>
    %81 = vector.multi_reduction <maximumf>, %80, %cst_59 [0] : vector<8x8xf32> to vector<8xf32>
    %82 = vector.shape_cast %81 : vector<8xf32> to vector<1x8xf32>
    %83 = vector.broadcast %82 : vector<1x8xf32> to vector<8x8xf32>
    %84 = arith.subf %80, %83 : vector<8x8xf32>
    %85 = math.exp %84 : vector<8x8xf32>
    %86 = arith.truncf %85 : vector<8x8xf32> to vector<8x8xbf16>
    %c2_60 = arith.constant 2 : index
    %c0_61 = arith.constant 0 : index
    %c0_62 = arith.constant 0 : index
    %87 = vector.load %arg19[%c2_60, %c0_61, %c0_62] : memref<5x7x8xbf16, #tpu.memory_space<vmem>>, vector<1x7x8xbf16>
    %88 = vector.shape_cast %87 : vector<1x7x8xbf16> to vector<7x8xbf16>
    %cst_63 = arith.constant dense<0.000000e+00> : vector<7x8xf32>
    %89 = tpu.matmul %88, %86, %cst_63 {dimension_numbers = #tpu.dot_dimension_numbers<[1], [0], [0], [1], [0, 0, 1, 1], [], []>} : vector<7x8xbf16>, vector<8x8xbf16>, vector<7x8xf32> -> vector<7x8xf32>
    %90 = vector.extract_strided_slice %89 {offsets = [6, 0], sizes = [1, 8], strides = [1, 1]} : vector<7x8xf32> to vector<1x8xf32>
    %91 = tpu.reciprocal %90 {approx = true} : vector<1x8xf32> -> vector<1x8xf32>
    %92 = vector.extract_strided_slice %89 {offsets = [0, 0], sizes = [6, 8], strides = [1, 1]} : vector<7x8xf32> to vector<6x8xf32>
    %93 = vector.broadcast %91 : vector<1x8xf32> to vector<6x8xf32>
    %94 = arith.mulf %92, %93 : vector<6x8xf32>
    %c12 = arith.constant 12 : index
    %c0_64 = arith.constant 0 : index
    %95 = vector.load %arg20[%c12, %c0_64] : memref<30x8xf32, #tpu.memory_space<vmem>>, vector<6x8xf32>
    tpu.vector_store %arg20[%c12, %c0_64], %94 {strides = array<i32>} : memref<30x8xf32, #tpu.memory_space<vmem>>, vector<6x8xf32>,
    %c3 = arith.constant 3 : index
    %c0_65 = arith.constant 0 : index
    %c0_66 = arith.constant 0 : index
    %96 = vector.load %arg9[%c3, %c0_65, %c0_66] : memref<5x6x30xf32, #tpu.memory_space<vmem>>, vector<1x6x30xf32>
    %97 = vector.shape_cast %96 : vector<1x6x30xf32> to vector<6x30xf32>
    %cst_67 = arith.constant dense<0.000000e+00> : vector<6x8xf32>
    %98 = tpu.matmul %97, %17, %cst_67 {dimension_numbers = #tpu.dot_dimension_numbers<[1], [0], [0], [1], [0, 0, 1, 1], [], []>} : vector<6x30xf32>, vector<30x8xf32>, vector<6x8xf32> -> vector<6x8xf32>
    %c3_68 = arith.constant 3 : index
    %c0_69 = arith.constant 0 : index
    %c0_70 = arith.constant 0 : index
    %99 = vector.load %arg10[%c3_68, %c0_69, %c0_70] : memref<5x6x1xf32, #tpu.memory_space<vmem>>, vector<1x6x1xf32>
    %100 = vector.shape_cast %99 : vector<1x6x1xf32> to vector<6x1xf32>
    %101 = vector.broadcast %100 : vector<6x1xf32> to vector<6x8xf32>
    %102 = arith.addf %98, %101 : vector<6x8xf32>
    %103 = arith.truncf %102 : vector<6x8xf32> to vector<6x8xbf16>
    %c3_71 = arith.constant 3 : index
    %c0_72 = arith.constant 0 : index
    %c0_73 = arith.constant 0 : index
    %104 = vector.load %arg18[%c3_71, %c0_72, %c0_73] : memref<5x8x6xbf16, #tpu.memory_space<vmem>>, vector<1x8x6xbf16>
    %105 = vector.shape_cast %104 : vector<1x8x6xbf16> to vector<8x6xbf16>
    %cst_74 = arith.constant dense<0.000000e+00> : vector<8x8xf32>
    %106 = tpu.matmul %105, %103, %cst_74 {dimension_numbers = #tpu.dot_dimension_numbers<[1], [0], [0], [1], [0, 0, 1, 1], [], []>} : vector<8x6xbf16>, vector<6x8xbf16>, vector<8x8xf32> -> vector<8x8xf32>
    %cst_75 = arith.constant dense<0xFF800000> : vector<8xf32>
    %107 = vector.multi_reduction <maximumf>, %106, %cst_75 [0] : vector<8x8xf32> to vector<8xf32>
    %108 = vector.shape_cast %107 : vector<8xf32> to vector<1x8xf32>
    %109 = vector.broadcast %108 : vector<1x8xf32> to vector<8x8xf32>
    %110 = arith.subf %106, %109 : vector<8x8xf32>
    %111 = math.exp %110 : vector<8x8xf32>
    %112 = arith.truncf %111 : vector<8x8xf32> to vector<8x8xbf16>
    %c3_76 = arith.constant 3 : index
    %c0_77 = arith.constant 0 : index
    %c0_78 = arith.constant 0 : index
    %113 = vector.load %arg19[%c3_76, %c0_77, %c0_78] : memref<5x7x8xbf16, #tpu.memory_space<vmem>>, vector<1x7x8xbf16>
    %114 = vector.shape_cast %113 : vector<1x7x8xbf16> to vector<7x8xbf16>
    %cst_79 = arith.constant dense<0.000000e+00> : vector<7x8xf32>
    %115 = tpu.matmul %114, %112, %cst_79 {dimension_numbers = #tpu.dot_dimension_numbers<[1], [0], [0], [1], [0, 0, 1, 1], [], []>} : vector<7x8xbf16>, vector<8x8xbf16>, vector<7x8xf32> -> vector<7x8xf32>
    %116 = vector.extract_strided_slice %115 {offsets = [6, 0], sizes = [1, 8], strides = [1, 1]} : vector<7x8xf32> to vector<1x8xf32>
    %117 = tpu.reciprocal %116 {approx = true} : vector<1x8xf32> -> vector<1x8xf32>
    %118 = vector.extract_strided_slice %115 {offsets = [0, 0], sizes = [6, 8], strides = [1, 1]} : vector<7x8xf32> to vector<6x8xf32>
    %119 = vector.broadcast %117 : vector<1x8xf32> to vector<6x8xf32>
    %120 = arith.mulf %118, %119 : vector<6x8xf32>
    %c18 = arith.constant 18 : index
    %c0_80 = arith.constant 0 : index
    %121 = vector.load %arg20[%c18, %c0_80] : memref<30x8xf32, #tpu.memory_space<vmem>>, vector<6x8xf32>
    tpu.vector_store %arg20[%c18, %c0_80], %120 {strides = array<i32>} : memref<30x8xf32, #tpu.memory_space<vmem>>, vector<6x8xf32>,
    %c4 = arith.constant 4 : index
    %c0_81 = arith.constant 0 : index
    %c0_82 = arith.constant 0 : index
    %122 = vector.load %arg9[%c4, %c0_81, %c0_82] : memref<5x6x30xf32, #tpu.memory_space<vmem>>, vector<1x6x30xf32>
    %123 = vector.shape_cast %122 : vector<1x6x30xf32> to vector<6x30xf32>
    %cst_83 = arith.constant dense<0.000000e+00> : vector<6x8xf32>
    %124 = tpu.matmul %123, %17, %cst_83 {dimension_numbers = #tpu.dot_dimension_numbers<[1], [0], [0], [1], [0, 0, 1, 1], [], []>} : vector<6x30xf32>, vector<30x8xf32>, vector<6x8xf32> -> vector<6x8xf32>
    %c4_84 = arith.constant 4 : index
    %c0_85 = arith.constant 0 : index
    %c0_86 = arith.constant 0 : index
    %125 = vector.load %arg10[%c4_84, %c0_85, %c0_86] : memref<5x6x1xf32, #tpu.memory_space<vmem>>, vector<1x6x1xf32>
    %126 = vector.shape_cast %125 : vector<1x6x1xf32> to vector<6x1xf32>
    %127 = vector.broadcast %126 : vector<6x1xf32> to vector<6x8xf32>
    %128 = arith.addf %124, %127 : vector<6x8xf32>
    %129 = arith.truncf %128 : vector<6x8xf32> to vector<6x8xbf16>
    %c4_87 = arith.constant 4 : index
    %c0_88 = arith.constant 0 : index
    %c0_89 = arith.constant 0 : index
    %130 = vector.load %arg18[%c4_87, %c0_88, %c0_89] : memref<5x8x6xbf16, #tpu.memory_space<vmem>>, vector<1x8x6xbf16>
    %131 = vector.shape_cast %130 : vector<1x8x6xbf16> to vector<8x6xbf16>
    %cst_90 = arith.constant dense<0.000000e+00> : vector<8x8xf32>
    %132 = tpu.matmul %131, %129, %cst_90 {dimension_numbers = #tpu.dot_dimension_numbers<[1], [0], [0], [1], [0, 0, 1, 1], [], []>} : vector<8x6xbf16>, vector<6x8xbf16>, vector<8x8xf32> -> vector<8x8xf32>
    %cst_91 = arith.constant dense<0xFF800000> : vector<8xf32>
    %133 = vector.multi_reduction <maximumf>, %132, %cst_91 [0] : vector<8x8xf32> to vector<8xf32>
    %134 = vector.shape_cast %133 : vector<8xf32> to vector<1x8xf32>
    %135 = vector.broadcast %134 : vector<1x8xf32> to vector<8x8xf32>
    %136 = arith.subf %132, %135 : vector<8x8xf32>
    %137 = math.exp %136 : vector<8x8xf32>
    %138 = arith.truncf %137 : vector<8x8xf32> to vector<8x8xbf16>
    %c4_92 = arith.constant 4 : index
    %c0_93 = arith.constant 0 : index
    %c0_94 = arith.constant 0 : index
    %139 = vector.load %arg19[%c4_92, %c0_93, %c0_94] : memref<5x7x8xbf16, #tpu.memory_space<vmem>>, vector<1x7x8xbf16>
    %140 = vector.shape_cast %139 : vector<1x7x8xbf16> to vector<7x8xbf16>
    %cst_95 = arith.constant dense<0.000000e+00> : vector<7x8xf32>
    %141 = tpu.matmul %140, %138, %cst_95 {dimension_numbers = #tpu.dot_dimension_numbers<[1], [0], [0], [1], [0, 0, 1, 1], [], []>} : vector<7x8xbf16>, vector<8x8xbf16>, vector<7x8xf32> -> vector<7x8xf32>
    %142 = vector.extract_strided_slice %141 {offsets = [6, 0], sizes = [1, 8], strides = [1, 1]} : vector<7x8xf32> to vector<1x8xf32>
    %143 = tpu.reciprocal %142 {approx = true} : vector<1x8xf32> -> vector<1x8xf32>
    %144 = vector.extract_strided_slice %141 {offsets = [0, 0], sizes = [6, 8], strides = [1, 1]} : vector<7x8xf32> to vector<6x8xf32>
    %145 = vector.broadcast %143 : vector<1x8xf32> to vector<6x8xf32>
    %146 = arith.mulf %144, %145 : vector<6x8xf32>
    %c24 = arith.constant 24 : index
    %c0_96 = arith.constant 0 : index
    %147 = vector.load %arg20[%c24, %c0_96] : memref<30x8xf32, #tpu.memory_space<vmem>>, vector<6x8xf32>
    tpu.vector_store %arg20[%c24, %c0_96], %146 {strides = array<i32>} : memref<30x8xf32, #tpu.memory_space<vmem>>, vector<6x8xf32>,
    %c0_97 = arith.constant 0 : index
    %c0_98 = arith.constant 0 : index
    %148 = vector.load %arg20[%c0_97, %c0_98] : memref<30x8xf32, #tpu.memory_space<vmem>>, vector<30x8xf32>
    %149 = arith.negf %17 : vector<30x8xf32>
    %150 = math.exp %149 : vector<30x8xf32>
    %cst_99 = arith.constant 1.000000e+00 : f32
    %151 = vector.broadcast %cst_99 : f32 to vector<30x8xf32>
    %152 = arith.addf %151, %150 : vector<30x8xf32>
    %153 = arith.divf %151, %152 : vector<30x8xf32>
    %cst_100 = arith.constant 1.000000e+00 : f32
    %154 = vector.broadcast %cst_100 : f32 to vector<30x8xf32>
    %155 = arith.subf %154, %153 : vector<30x8xf32>
    %cst_101 = arith.constant 1.000000e-01 : f32
    %156 = vector.broadcast %cst_101 : f32 to vector<30x8xf32>
    %157 = arith.cmpf ogt, %153, %156 : vector<30x8xf32>
    %cst_102 = arith.constant 0.000000e+00 : f32
    %158 = vector.broadcast %cst_102 : f32 to vector<30x8xf32>
    %159 = arith.select %157, %155, %158 : vector<30x8xi1>, vector<30x8xf32>
    %cst_103 = arith.constant 1.000000e-01 : f32
    %160 = vector.broadcast %cst_103 : f32 to vector<30x8xf32>
    %161 = arith.cmpf ogt, %155, %160 : vector<30x8xf32>
    %cst_104 = arith.constant 0.000000e+00 : f32
    %162 = vector.broadcast %cst_104 : f32 to vector<30x8xf32>
    %163 = arith.select %161, %155, %162 : vector<30x8xi1>, vector<30x8xf32>
    %164 = arith.mulf %159, %17 : vector<30x8xf32>
    %165 = arith.mulf %163, %148 : vector<30x8xf32>
    %166 = arith.addf %164, %165 : vector<30x8xf32>
    %cst_105 = arith.constant dense<0.000000e+00> : vector<8xf32>
    %167 = vector.multi_reduction <add>, %166, %cst_105 [0] : vector<30x8xf32> to vector<8xf32>
    %168 = vector.shape_cast %167 : vector<8xf32> to vector<1x8xf32>
    %cst_106 = arith.constant 3.000000e+01 : f32
    %169 = vector.broadcast %cst_106 : f32 to vector<1x8xf32>
    %170 = arith.divf %168, %169 : vector<1x8xf32>
    %171 = vector.broadcast %170 : vector<1x8xf32> to vector<30x8xf32>
    %172 = arith.subf %166, %171 : vector<30x8xf32>
    %173 = arith.mulf %172, %172 : vector<30x8xf32>
    %cst_107 = arith.constant dense<0.000000e+00> : vector<8xf32>
    %174 = vector.multi_reduction <add>, %173, %cst_107 [0] : vector<30x8xf32> to vector<8xf32>
    %175 = vector.shape_cast %174 : vector<8xf32> to vector<1x8xf32>
    %cst_108 = arith.constant 3.000000e+01 : f32
    %176 = vector.broadcast %cst_108 : f32 to vector<1x8xf32>
    %177 = arith.divf %175, %176 : vector<1x8xf32>
    %178 = vector.broadcast %170 : vector<1x8xf32> to vector<30x8xf32>
    %179 = arith.subf %166, %178 : vector<30x8xf32>
    %cst_109 = arith.constant 9.99999974E-6 : f32
    %180 = vector.broadcast %cst_109 : f32 to vector<1x8xf32>
    %181 = arith.addf %177, %180 : vector<1x8xf32>
    %182 = math.rsqrt %181 : vector<1x8xf32>
    %183 = vector.broadcast %182 : vector<1x8xf32> to vector<30x8xf32>
    %184 = arith.mulf %179, %183 : vector<30x8xf32>
    %c0_110 = arith.constant 0 : index
    %c0_111 = arith.constant 0 : index
    %185 = vector.load %arg15[%c0_110, %c0_111] : memref<30x1xf32, #tpu.memory_space<vmem>>, vector<30x1xf32>
    %186 = vector.broadcast %185 : vector<30x1xf32> to vector<30x8xf32>
    %187 = arith.mulf %184, %186 : vector<30x8xf32>
    %c0_112 = arith.constant 0 : index
    %c0_113 = arith.constant 0 : index
    %188 = vector.load %arg16[%c0_112, %c0_113] : memref<30x1xf32, #tpu.memory_space<vmem>>, vector<30x1xf32>
    %189 = vector.broadcast %188 : vector<30x1xf32> to vector<30x8xf32>
    %190 = arith.addf %187, %189 : vector<30x8xf32>
    %c0_114 = arith.constant 0 : index
    %c0_115 = arith.constant 0 : index
    %c0_116 = arith.constant 0 : index
    %191 = vector.load %arg17[%c0_114, %c0_115, %c0_116] : memref<1x30x8xf32, #tpu.memory_space<vmem>>, vector<1x30x8xf32>
    %192 = vector.shape_cast %191 : vector<1x30x8xf32> to vector<30x8xf32>
    %193 = vector.shape_cast %190 : vector<30x8xf32> to vector<1x30x8xf32>
    tpu.vector_store %arg17[%c0_114, %c0_115, %c0_116], %193 {strides = array<i32>} : memref<1x30x8xf32, #tpu.memory_space<vmem>>, vector<1x30x8xf32>,
    return
  }
  func.func @transform_0(%arg0: i32, %arg1: i32) -> (i32, i32, i32) {
    %c0_i32 = arith.constant 0 : i32
    %c0_i32_0 = arith.constant 0 : i32
    return %arg0, %c0_i32, %arg1 : i32, i32, i32
  }
  func.func @transform_1(%arg0: i32, %arg1: i32) -> (i32, i32, i32) {
    %c0_i32 = arith.constant 0 : i32
    %c0_i32_0 = arith.constant 0 : i32
    %c0_i32_1 = arith.constant 0 : i32
    return %arg0, %c0_i32, %c0_i32_0 : i32, i32, i32
  }
  func.func @transform_2(%arg0: i32, %arg1: i32) -> (i32, i32) {
    %c0_i32 = arith.constant 0 : i32
    %c0_i32_0 = arith.constant 0 : i32
    %c0_i32_1 = arith.constant 0 : i32
    return %c0_i32, %c0_i32_0 : i32, i32
  }
  func.func @transform_3(%arg0: i32, %arg1: i32) -> (i32, i32) {
    %c0_i32 = arith.constant 0 : i32
    %c0_i32_0 = arith.constant 0 : i32
    %c0_i32_1 = arith.constant 0 : i32
    return %c0_i32, %c0_i32_0 : i32, i32
  }
  func.func @transform_4(%arg0: i32, %arg1: i32) -> (i32, i32) {
    %c0_i32 = arith.constant 0 : i32
    %c0_i32_0 = arith.constant 0 : i32
    %c0_i32_1 = arith.constant 0 : i32
    return %c0_i32, %c0_i32_0 : i32, i32
  }
  func.func @transform_5(%arg0: i32, %arg1: i32) -> (i32, i32) {
    %c0_i32 = arith.constant 0 : i32
    %c0_i32_0 = arith.constant 0 : i32
    %c0_i32_1 = arith.constant 0 : i32
    return %c0_i32, %c0_i32_0 : i32, i32
  }
  func.func @transform_6(%arg0: i32, %arg1: i32) -> (i32, i32) {
    %c0_i32 = arith.constant 0 : i32
    %c0_i32_0 = arith.constant 0 : i32
    %c0_i32_1 = arith.constant 0 : i32
    return %c0_i32, %c0_i32_0 : i32, i32
  }
  func.func @transform_7(%arg0: i32, %arg1: i32) -> (i32, i32, i32) {
    %c0_i32 = arith.constant 0 : i32
    %c0_i32_0 = arith.constant 0 : i32
    %c0_i32_1 = arith.constant 0 : i32
    %c0_i32_2 = arith.constant 0 : i32
    return %c0_i32, %c0_i32_0, %c0_i32_1 : i32, i32, i32
  }
  func.func @transform_8(%arg0: i32, %arg1: i32) -> (i32, i32, i32) {
    %c0_i32 = arith.constant 0 : i32
    %c0_i32_0 = arith.constant 0 : i32
    %c0_i32_1 = arith.constant 0 : i32
    %c0_i32_2 = arith.constant 0 : i32
    return %c0_i32, %c0_i32_0, %c0_i32_1 : i32, i32, i32
  }
  func.func @transform_9(%arg0: i32, %arg1: i32) -> (i32, i32, i32) {
    %c0_i32 = arith.constant 0 : i32
    %c0_i32_0 = arith.constant 0 : i32
    %c0_i32_1 = arith.constant 0 : i32
    %c0_i32_2 = arith.constant 0 : i32
    return %c0_i32, %c0_i32_0, %c0_i32_1 : i32, i32, i32
  }
  func.func @transform_10(%arg0: i32, %arg1: i32) -> (i32, i32, i32) {
    %c0_i32 = arith.constant 0 : i32
    %c0_i32_0 = arith.constant 0 : i32
    %c0_i32_1 = arith.constant 0 : i32
    %c0_i32_2 = arith.constant 0 : i32
    return %c0_i32, %c0_i32_0, %c0_i32_1 : i32, i32, i32
  }
  func.func @transform_11(%arg0: i32, %arg1: i32) -> (i32, i32, i32) {
    %c0_i32 = arith.constant 0 : i32
    %c0_i32_0 = arith.constant 0 : i32
    %c0_i32_1 = arith.constant 0 : i32
    %c0_i32_2 = arith.constant 0 : i32
    return %c0_i32, %c0_i32_0, %c0_i32_1 : i32, i32, i32
  }
  func.func @transform_12(%arg0: i32, %arg1: i32) -> (i32, i32, i32) {
    %c0_i32 = arith.constant 0 : i32
    %c0_i32_0 = arith.constant 0 : i32
    %c0_i32_1 = arith.constant 0 : i32
    %c0_i32_2 = arith.constant 0 : i32
    return %c0_i32, %c0_i32_0, %c0_i32_1 : i32, i32, i32
  }
  func.func @transform_13(%arg0: i32, %arg1: i32) -> (i32, i32) {
    %c0_i32 = arith.constant 0 : i32
    %c0_i32_0 = arith.constant 0 : i32
    %c0_i32_1 = arith.constant 0 : i32
    return %c0_i32, %c0_i32_0 : i32, i32
  }
  func.func @transform_14(%arg0: i32, %arg1: i32) -> (i32, i32) {
    %c0_i32 = arith.constant 0 : i32
    %c0_i32_0 = arith.constant 0 : i32
    %c0_i32_1 = arith.constant 0 : i32
    return %c0_i32, %c0_i32_0 : i32, i32
  }
  func.func @transform_15(%arg0: i32, %arg1: i32) -> (i32, i32, i32) {
    %c0_i32 = arith.constant 0 : i32
    %c0_i32_0 = arith.constant 0 : i32
    return %arg0, %c0_i32, %arg1 : i32, i32, i32
  }
}

</mosaic_0001>

<bundles_post_ra>
// kernel: tpu_custom_call.1
= control target key start
LH: loop header
LB: loop body
LE: loop exit
PB: predicated region body
PF: predicated region fallthrough
CT: control target
= control target key end

     0   :  { %s4088_s18 = smov 0   ;;  %s4090_s19 = smov 0   ;;  %s4662_s0 = inlined_call_operand.vmem [shape: f32[2,16,8], index: 0, kind: input, shape index: {}]   ;;  %s4663_s1 = inlined_call_operand.vmem [shape: f32[2,16,8], index: 1, kind: input, shape index: {}]   ;;  %s4664_s2 = inlined_call_operand.vmem [shape: f32[8,16], index: 2, kind: input, shape index: {}]   ;;  %s4665_s3 = inlined_call_operand.vmem [shape: f32[8,1], index: 3, kind: input, shape index: {}]   ;;  %s4666_s4 = inlined_call_operand.vmem [shape: f32[16,8], index: 4, kind: input, shape index: {}]   ;;  %s4667_s5 = inlined_call_operand.vmem [shape: f32[16,1], index: 5, kind: input, shape index: {}]   ;;  %s4668_s6 = inlined_call_operand.vmem [shape: f32[30,16], index: 6, kind: input, shape index: {}]   ;;  %s4669_s7 = inlined_call_operand.vmem [shape: f32[5,6,30], index: 7, kind: input, shape index: {}]   ;;  %s4670_s8 = inlined_call_operand.vmem [shape: f32[5,6,1], index: 8, kind: input, shape index: {}]   ;;  %s4671_s9 = inlined_call_operand.vmem [shape: f32[5,30,6], index: 9, kind: input, shape index: {}]   ;;  %s4672_s10 = inlined_call_operand.vmem [shape: f32[5,1,6], index: 10, kind: input, shape index: {}]   ;;  %s4673_s11 = inlined_call_operand.vmem [shape: f32[5,6,30], index: 11, kind: input, shape index: {}]   ;;  %s4674_s12 = inlined_call_operand.vmem [shape: f32[5,6,1], index: 12, kind: input, shape index: {}]   ;;  %s4675_s13 = inlined_call_operand.vmem [shape: f32[30,1], index: 13, kind: input, shape index: {}]   ;;  %s4676_s14 = inlined_call_operand.vmem [shape: f32[30,1], index: 14, kind: input, shape index: {}]   ;;  %s4677_s15 = inlined_call_operand.vmem [shape: f32[2,30,8], index: 15, kind: output, shape index: {}]  }
   0x1   :  { %s4092_s20 = smov 0  }
   0x2 LB: > { %s37_s21 = sadd.s32 1, %s3997_s19  ;;  %p3292_p0 = scmp.ge.s32.totalorder %s4001_s20, 1  ;;  %s4001_s20 = sphi %s4092_s20, %s25_s20   ;;  %s3997_s19 = sphi %s4090_s19, %s4683_s19   ;;  %s3993_s18 = sphi %s4088_s18, %s4682_s18  }
   0x3   : > { %p39_p1 = scmp.ge.s32.totalorder %s37_s21, 2  ;;  %p466_p2 = scmp.lt.s32.totalorder %s4001_s20, 3 }
   0x5   : > { %s4685_s21 = smov (%p39_p1, %s37_s21), 0  ;;  %p467_p3 = pnand %p3292_p0, %p466_p2 }
   0x6   : > { %p525_p4 = scmp.lt.s32.totalorder (!%p467_p3), %s3993_s18, 1  ;;  %v555_v0 = vld [vmem:[%s4665_s3] sm:$0xff] (!%p467_p3)  ;;  %v4003_v1 = vmov (!%p467_p3), 0.0|0.0   ;;  %vm4004_vm0 = vmmov (!%p467_p3), 0   ;;  %v4005_v2 = vmov (!%p467_p3), 0.0   ;;  %v4006_v3 = vmov (!%p467_p3), 0  }
   0x7   : > { %470 = sbr.rel (%p467_p3) target bundleno = 3286 (0xcd6), region = 80  ;;  %3791 = vmatprep.subr.bf16.mxu0 (!%p467_p3), %v4003_v1  ;;  %3526 = vmatprep.mubr.msk.f32.mxu0 (!%p467_p3), %vm4004_vm0, %v4005_v2  ;;  %v1844_v4 = vld [vmem:[%s4667_s5 + $0x8] sm:$0xff] (!%p467_p3)  ;;  %v637_v5 = vld [vmem:[%s4667_s5] sm:$0xff] (!%p467_p3)  ;;  %vm561_vm1 = vcmask (!%p467_p3), 130048   ;;  %v3377_v14 = vld [vmem:[%s4670_s8 + $0x10] sm:$0x3f] (!%p467_p3) }
   0x8   : > { %3939 = vset.pattern.permute.xlu0 (!%p467_p3), %v4006_v3  ;;  %3940 = vset.pattern.permute.xlu1 (!%p467_p3), %v4006_v3  ;;  %v4135_v9 = vld [vmem:[%s4664_s2] sm:$0xff] (!%p467_p3)  ;;  %v3371_v12 = vld [vmem:[%s4670_s8 + $0x8] sm:$0x3f] (!%p467_p3)  ;;  %v3332_v15 = vld [vmem:[%s4674_s12 + $0x10] sm:$0x3f] (!%p467_p3)  ;;  %vm649_vm2 = vcmask (!%p467_p3), 64512  }
   0x9   : > { %558 = vperm.xlu0 (!%p467_p3), %3939, %v555_v0   ;;  %646 = vperm.xlu1 (!%p467_p3), %3940, %v1844_v4   ;;  %v2041_v10 = vld [vmem:[%s4670_s8] sm:$0x3f] (!%p467_p3)  ;;  %v3320_v13 = vld [vmem:[%s4674_s12 + $0x8] sm:$0x3f] (!%p467_p3)  ;;  %v3383_v16 = vld [vmem:[%s4670_s8 + $0x18] sm:$0x3f] (!%p467_p3) }
   0xa   : > { %v959_v11 = vld [vmem:[%s4674_s12] sm:$0x3f] (!%p467_p3)  ;;  %v3344_v17 = vld [vmem:[%s4674_s12 + $0x18] sm:$0x3f] (!%p467_p3)  ;;  %v3134_v20 = vld [vmem:[%s4675_s13 + $0x8] sm:$0xff] (!%p467_p3)  ;;  %vm881_vm3 = vcmask (!%p467_p3), 1045504  }
   0xb   : > { %v3389_v18 = vld [vmem:[%s4670_s8 + $0x20] sm:$0x3f] (!%p467_p3)  ;;  %v3135_v21 = vld [vmem:[%s4675_s13 + $0x10] sm:$0xff] (!%p467_p3)  ;;  %v3136_v22 = vld [vmem:[%s4675_s13 + $0x18] sm:$0x3f] (!%p467_p3)  ;;  %vm4007_vm4 = vmmov (!%p467_p3), 1  }
   0xc   : > { %v3356_v19 = vld [vmem:[%s4674_s12 + $0x20] sm:$0x3f] (!%p467_p3)  ;;  %v3162_v24 = vld [vmem:[%s4676_s14 + $0x8] sm:$0xff] (!%p467_p3)  ;;  %v3163_v25 = vld [vmem:[%s4676_s14 + $0x10] sm:$0xff] (!%p467_p3)  ;;  %vm877_vm6 = vcmask (!%p467_p3), 244736   ;;  %vm1044_vm7 = vcmask (!%p467_p3), 60419  }
   0xd   : > { %641 = vperm.xlu0 (!%p467_p3), %3939, %v637_v5   ;;  %v3161_v23 = vld [vmem:[%s4676_s14] sm:$0xff] (!%p467_p3)  ;;  %v3164_v26 = vld [vmem:[%s4676_s14 + $0x18] sm:$0x3f] (!%p467_p3)  ;;  %v4203_v32 = vld [vmem:[%s4666_s4 + $0x8] sm:$0xff] (!%p467_p3)  ;;  %vm1045_vm8 = vsmask.f32 (!%p467_p3), 3328 }
   0xe   : > { %s4687_s18 = smov (!%p525_p4, %s3993_s18), 1  ;;  %v4196_v27 = vld [vmem:[%s4666_s4] sm:$0xff]  ;;  %v4219_v43 = vld [vmem:[%s4668_s6 + $0x8] sm:$0xff]  ;;  %v4224_v44 = vld [vmem:[%s4668_s6 + $0x10] sm:$0xff]  ;;  %vm1042_vm10 = vcmask 59392   ;;  %vm956_vm11 = vcmask 44032  }
   0xf   : > { %s3400_s26 = sshll.u32 %s4687_s18, 4  ;;  %3531 = vmatprep.mubr.msk.f32.mxu1 %vm649_vm2, %v4196_v27  ;;  %v4210_v33 = vld [vmem:[%s4668_s6] sm:$0xff]  ;;  %v734_v45 = vld [vmem:[%s4668_s6 + $0x18] sm:$0x3f]  ;;  %v835_v47 = vld [vmem:[%s4671_s9 + $0x8] sm:$0xff]  ;;  %vm2131_vm12 = vcmask 1042432  }
  0x10   : > { %s537_s16 = scalar_lea.vmem %s4663_s1, %s3400_s26  ;;  %v834_v46 = vld [vmem:[%s4671_s9] sm:$0xff]  ;;  %v836_v48 = vld [vmem:[%s4671_s9 + $0x10] sm:$0xff]  ;;  %v837_v50 = vld [vmem:[%s4671_s9 + $0x18] sm:$0x3f]  ;;  %s532_s23 = scalar_lea.vmem %s4662_s0, %s3400_s26  ;;  %vm2127_vm13 = vcmask 48128   ;;  %vm2190_vm14 = vcmask 1043456  }
  0x11   : > { %v4126_v6 = vld [vmem:[%s537_s16] sm:$0xff]  ;;  %v4128_v7 = vld [vmem:[%s537_s16 + $0x8] sm:$0xff]  ;;  %1764 = vperm.xlu0 %3939, %v555_v0   ;;  %v3799_v49 = vpack.c.bf16 %v835_v47, %v834_v46  ;;  %v3802_v51 = vpack.c.bf16 %v837_v50, %v836_v48  ;;  %vm4250_vm5 = vmpackc.low %vm881_vm3, %vm4007_vm4  ;;  %vm2240_vm15 = vcmask 62464   ;;  %s3402_s26 = sshll.u32 %s4687_s18, 5 }
  0x12   : > { %v3792_v8 = vpack.c.bf16 %v4128_v7, %v4126_v6  ;;  %v958_v59 = vld [vmem:[%s4673_s11] sm:$0x3f]  ;;  %v3319_v60 = vld [vmem:[%s4673_s11 + $0x8] sm:$0x3f]  ;;  %v3331_v61 = vld [vmem:[%s4673_s11 + $0x10] sm:$0x3f]  ;;  %s545_s27 = scalar_lea.vmem %s4677_s15, %s3402_s26 }
  0x13   : > { %v3343_v62 = vld [vmem:[%s4673_s11 + $0x18] sm:$0x3f]  ;;  %v3355_v63 = vld [vmem:[%s4673_s11 + $0x20] sm:$0x3f]  ;;  %vm4309_vm9 = vmand %vm1044_vm7, %vm1045_vm8 }
  0x14   : > { %3793 = vmatpush3.bf16.msra.mxu0 %v3792_v8  ;;  %v3133_v0 = vld [vmem:[%s4675_s13] sm:$0xff]  ;;  %v1401_v8 = vld [vmem:[#allocation3 + $0x8] sm:$0x8] }
  0x15   : > { %3798 = vmatprep.subr.bf16.mxu0 %v4003_v1  ;;  %1847 = vperm.xlu0 %3939, %v637_v5  }
  0x17   : > { %3527 = vmatmul.mubr.msk.f32.vlgmr.msra.gmra.mrb[0].mxu0 %vm561_vm1, %v4135_v9 }
  0x18   : > { %3552 = vmatprep.mubr.msk.f32.mxu0 %vm4004_vm0, %v4005_v2  ;;  %3800 = vmatpush3.bf16.msra.mxu0 %v3799_v49 }
  0x19   : > { %1852 = vperm.xlu0 %3939, %v1844_v4   ;;  %3801 = vmatprep.subr.bf16.mxu0 %v4003_v1  ;;  %v1047_v4 = vld [vmem:[#allocation3] sm:$0x8] }
  0x1a   : > { %v1048_v5 = vsel %vm4309_vm9, 1065369472, %v1047_v4 }
  0x1b   : > { %1049 = vst [vmem:[#allocation3] sm:$0x8] %v1048_v5 }
  0x1c   : > { %3804 = vmatpush3.bf16.msk.msra.mxu0 %vm4250_vm5, %v3802_v51 }
  0x1d   : > { %2044 = vperm.xlu0 %3939, %v2041_v10   ;;  %3812 = vmatprep.subr.bf16.mxu0 %v4003_v1  ;;  %v1402_v10 = vsel %vm4309_vm9, 1065369472, %v1401_v8 }
  0x1e   : > { %1403 = vst [vmem:[#allocation3 + $0x8] sm:$0x8] %v1402_v10 }
  0x21   : > { %962 = vperm.xlu0 %3939, %v959_v11   ;;  %v1578_v11 = vld [vmem:[#allocation3 + $0xc] sm:$0x8] }
  0x25   : > { %2248 = vperm.xlu0 %3939, %v3371_v12   ;;  %v1579_v12 = vsel %vm4309_vm9, 1065369472, %v1578_v11 }
  0x26   : > { %1580 = vst [vmem:[#allocation3 + $0xc] sm:$0x8] %v1579_v12 }
  0x29   : > { %1145 = vperm.xlu0 %3939, %v3320_v13   ;;  %v3311_v13 = vld [vmem:[%s4671_s9 + $0x20] sm:$0xff] }
  0x2d   : > { %2445 = vperm.xlu0 %3939, %v3377_v14   ;;  %v3312_v14 = vld [vmem:[%s4671_s9 + $0x28] sm:$0xff] }
  0x31   : > { %1322 = vperm.xlu0 %3939, %v3332_v15   ;;  %v3813_v15 = vpack.c.bf16 %v3312_v14, %v3311_v13 }
  0x35   : > { %2642 = vperm.xlu0 %3939, %v3383_v16   ;;  %v3313_v16 = vld [vmem:[%s4671_s9 + $0x30] sm:$0xff] }
  0x39   : > { %1499 = vperm.xlu0 %3939, %v3344_v17   ;;  %v3314_v17 = vld [vmem:[%s4671_s9 + $0x38] sm:$0x3f] }
  0x3d   : > { %2839 = vperm.xlu0 %3939, %v3389_v18  }
  0x41   : > { %1676 = vperm.xlu0 %3939, %v3356_v19   ;;  %v1755_v19 = vld [vmem:[#allocation3 + $0x10] sm:$0x8] }
  0x45   : > { %3144 = vperm.xlu0 %3939, %v3134_v20   ;;  %v3816_v20 = vpack.c.bf16 %v3314_v17, %v3313_v16 }
  0x49   : > { %3149 = vperm.xlu0 %3939, %v3135_v21   ;;  %v1756_v21 = vsel %vm4309_vm9, 1065369472, %v1755_v19 }
  0x4a   : > { %1757 = vst [vmem:[#allocation3 + $0x10] sm:$0x8] %v1756_v21 }
  0x4d   : > { %3154 = vperm.xlu0 %3939, %v3136_v22   ;;  %v3323_v22 = vld [vmem:[%s4671_s9 + $0x40] sm:$0xff] }
  0x51   : > { %3167 = vperm.xlu0 %3939, %v3161_v23   ;;  %v3324_v23 = vld [vmem:[%s4671_s9 + $0x48] sm:$0xff] }
  0x55   : > { %3172 = vperm.xlu0 %3939, %v3162_v24   ;;  %v3827_v24 = vpack.c.bf16 %v3324_v23, %v3323_v22  ;;  %v3316_v23 = vld [vmem:[%s4672_s10 + $0x1] ss:$0 sm:$0xff] }
  0x59   : > { %3177 = vperm.xlu0 %3939, %v3163_v25   ;;  %v3325_v25 = vld [vmem:[%s4671_s9 + $0x50] sm:$0xff] }
  0x5d   : > { %3182 = vperm.xlu0 %3939, %v3164_v26   ;;  %v3326_v26 = vld [vmem:[%s4671_s9 + $0x58] sm:$0x3f] }
  0x88   : > { %v559_v28 = vpop.permute.xlu0 %558  ;;  %v647_v34 = vpop.permute.xlu1 %646 }
  0x8c   : > { %v642_v36 = vpop.permute.xlu0 %641 }
  0x90   : > { %v4417_v47 = vpop.permute.xlu0 %1764 }
  0x94   : > { %v4419_v48 = vpop.permute.xlu0 %1847 }
  0x98   : > { %v4421_v49 = vpop.permute.xlu0 %1852 }
  0x9c   : > { %v4423_v50 = vpop.permute.xlu0 %2044 }
  0xa0   : > { %v963_v51 = vpop.permute.xlu0 %962 }
  0xea   : > { %v631_v29 = vpop.f32.mrb[0].mxu0 }
  0xeb   : > { %v632_v30 = vadd.f32 %v631_v29, %v559_v28  ;;  %v3528_v31 = vpop.f32.mrb[1].mxu0  ;;  %v3335_v28 = vld [vmem:[%s4671_s9 + $0x60] sm:$0xff]  ;;  %v3336_v29 = vld [vmem:[%s4671_s9 + $0x68] sm:$0xff] }
  0xec   : > { %v3337_v31 = vld [vmem:[%s4671_s9 + $0x70] sm:$0xff] }
  0xed   : > { %3529 = vmatprep.subr.mxu1 %v632_v30 }
  0xee   : > { %3530 = vmatpush3.msra.mxu1 %v632_v30  ;;  %v3841_v30 = vpack.c.bf16 %v3336_v29, %v3335_v28  ;;  %v3328_v28 = vld [vmem:[%s4672_s10 + $0x2] ss:$0 sm:$0xff] }
  0xef   : > { %3532 = vmatmul.mubr.msk.f32.vlgmr.msra.gmra.mrb[0].mxu1 %vm649_vm2, %v4203_v32 }
  0xf0   : > { %3538 = vmatprep.mubr.msk.f32.mxu1 %vm561_vm1, %v4210_v33 }
 0x1c2   : > { %v3533_v35 = vpop.f32.mrb[0].mxu1 }
 0x1c3   : > { %v728_v37 = vadd.f32 %v3533_v35, %v647_v34  ;;  %v722_v38 = vpop.f32.mrb[1].mxu1  ;;  %v3338_v34 = vld [vmem:[%s4671_s9 + $0x78] sm:$0x3f] }
 0x1c4   : > { %v723_v39 = vadd.f32 %v722_v38, %v642_v36  ;;  %v3844_v35 = vpack.c.bf16 %v3338_v34, %v3337_v31  ;;  %v3347_v36 = vld [vmem:[%s4671_s9 + $0x80] sm:$0xff] }
 0x1c5   : > { %v736_v40 = vadd.f32 %v728_v37, %v4128_v7  ;;  %v3348_v37 = vld [vmem:[%s4671_s9 + $0x88] sm:$0xff] }
 0x1c6   : > { %v735_v41 = vadd.f32 %v723_v39, %v4126_v6  ;;  %v1224_v6 = vld [vmem:[#allocation3 + $0x4] sm:$0x8]  ;;  %v3855_v38 = vpack.c.bf16 %v3348_v37, %v3347_v36  ;;  %v3349_v39 = vld [vmem:[%s4671_s9 + $0x90] sm:$0xff] }
 0x1c7   : > { %v1225_v7 = vsel %vm4309_vm9, 1065369472, %v1224_v6 }
 0x1c8   : > { %v3794_v42 = vpack.c.bf16 %v736_v40, %v735_v41  ;;  %1226 = vst [vmem:[#allocation3 + $0x4] sm:$0x8] %v1225_v7  ;;  %v3350_v40 = vld [vmem:[%s4671_s9 + $0x98] sm:$0x3f] }
 0x1c9   : > { %v3858_v41 = vpack.c.bf16 %v3350_v40, %v3349_v39  ;;  %v3352_v40 = vld [vmem:[%s4672_s10 + $0x4] ss:$0 sm:$0xff] }
 0x1ca   : > { %3795 = vmatprep.subr.bf16.mxu1 %v3794_v42 }
 0x1cb   : > { %3797 = vmatpush3.bf16.msra.mxu1 %v3794_v42  ;;  %v4400_v42 = vld [vmem:[%s532_s23] sm:$0xff] }
 0x1cc   : > { %3805 = vmatprep.subr.bf16.mxu1 %v4003_v1 }
 0x1ce   : > { %3539 = vmatmul.mubr.msk.f32.vlgmr.msra.gmra.mrb[2].mxu1 %vm561_vm1, %v4219_v43 }
 0x1cf   : > { %3541 = vmatprep.mubr.msk.f32.mxu1 %vm561_vm1, %v4224_v44 }
 0x1d2   : > { %3542 = vmatmul.mubr.msk.f32.gmra.mrb[4].mxu1 %vm561_vm1, %v734_v45  ;;  %v4402_v45 = vld [vmem:[%s532_s23 + $0x8] sm:$0xff] }
 0x1d3   : > { %3563 = vmatprep.mubr.msk.f32.mxu1 %vm4004_vm0, %v4005_v2  ;;  %v3869_v46 = vpack.c.bf16 %v4402_v45, %v4400_v42 }
 0x2a1   : > { %v3540_v53 = vpop.f32.mrb[2].mxu1 }
 0x2a2   : > { %v815_v54 = vpop.f32.mrb[3].mxu1 }
 0x2a3   : > { %v3806_v55 = vpack.c.bf16 %v3540_v53, %v815_v54  ;;  %845 = vxpose.xlu1.b32.start [1/4] (short) (narrow) %v815_v54, 8 }
 0x2a5   : > { %v3543_v56 = vpop.f32.mrb[4].mxu1  ;;  %3807 = vmatpush3.bf16.msra.mxu1 %v3806_v55 }
 0x2a6   : > { %v825_v57 = vpop.f32.mrb[5].mxu1  ;;  %3808 = vmatprep.subr.bf16.mxu1 %v4003_v1 }
 0x2a7   : > { %v3809_v58 = vpack.c.bf16 %v3543_v56, %v825_v57  ;;  %846 = vxpose.xlu1.b32.cont [2/4] (short) (narrow) %v3540_v53, 8  ;;  %v4425_v53 = vpop.permute.xlu0 %2248 }
 0x2a9   : > { %3811 = vmatpush3.bf16.msk.msra.mxu1 %vm4250_vm5, %v3809_v58 }
 0x2aa   : > { %3819 = vmatprep.subr.bf16.mxu1 %v4003_v1 }
 0x2ab   : > { %847 = vxpose.xlu1.b32.cont [3/4] (short) (narrow) %v825_v57, 8  ;;  %v1146_v54 = vpop.permute.xlu0 %1145 }
 0x2ac   : > { %3564 = vmatmul.mubr.msk.f32.vlgmr.msra.gmra.mrb[6].mxu1 %vm877_vm6, %v958_v59 }
 0x2ad   : > { %3821 = vmatpush3.bf16.msra.mxu1 %v3806_v55  ;;  %3585 = vmatprep.mubr.msk.f32.mxu1 %vm4004_vm0, %v4005_v2 }
 0x2ae   : > { %3822 = vmatprep.subr.bf16.mxu1 %v4003_v1 }
 0x2af   : > { %848 = vxpose.xlu1.b32.end [4/4] (short) (narrow) %v3543_v56, 8 }
 0x2b1   : > { %3825 = vmatpush3.bf16.msk.msra.mxu1 %vm4250_vm5, %v3809_v58 }
 0x2b2   : > { %3833 = vmatprep.subr.bf16.mxu1 %v4003_v1 }
 0x2b4   : > { %3586 = vmatmul.mubr.msk.f32.vlgmr.msra.gmra.mrb[8].mxu1 %vm877_vm6, %v3319_v60 }
 0x2b5   : > { %3835 = vmatpush3.bf16.msra.mxu1 %v3806_v55  ;;  %3607 = vmatprep.mubr.msk.f32.mxu1 %vm4004_vm0, %v4005_v2 }
 0x2b6   : > { %3836 = vmatprep.subr.bf16.mxu1 %v4003_v1 }
 0x2b9   : > { %3839 = vmatpush3.bf16.msk.msra.mxu1 %vm4250_vm5, %v3809_v58 }
 0x2ba   : > { %3847 = vmatprep.subr.bf16.mxu1 %v4003_v1 }
 0x2bc   : > { %3608 = vmatmul.mubr.msk.f32.vlgmr.msra.gmra.mrb[10].mxu1 %vm877_vm6, %v3331_v61 }
 0x2bd   : > { %3849 = vmatpush3.bf16.msra.mxu1 %v3806_v55  ;;  %3629 = vmatprep.mubr.msk.f32.mxu1 %vm4004_vm0, %v4005_v2 }
 0x2be   : > { %3850 = vmatprep.subr.bf16.mxu1 %v4003_v1 }
 0x2c1   : > { %3853 = vmatpush3.bf16.msk.msra.mxu1 %vm4250_vm5, %v3809_v58 }
 0x2c2   : > { %3861 = vmatprep.subr.bf16.mxu1 %v4003_v1 }
 0x2c4   : > { %3630 = vmatmul.mubr.msk.f32.vlgmr.msra.gmra.mrb[12].mxu1 %vm877_vm6, %v3343_v62 }
 0x2c5   : > { %3863 = vmatpush3.bf16.msra.mxu1 %v3806_v55  ;;  %3651 = vmatprep.mubr.msk.f32.mxu1 %vm4004_vm0, %v4005_v2 }
 0x2c6   : > { %3864 = vmatprep.subr.bf16.mxu1 %v4003_v1 }
 0x2c9   : > { %3867 = vmatpush3.bf16.msk.msra.mxu1 %vm4250_vm5, %v3809_v58  ;;  %v4427_v58 = vpop.permute.xlu0 %2445 }
 0x2cc   : > { %3652 = vmatmul.mubr.msk.f32.vlgmr.msra.gmra.mrb[14].mxu1 %vm877_vm6, %v3355_v63 }
 0x2cd   : > { %3139 = vperm.xlu1 %3940, %v3133_v0   ;;  %3663 = vmatprep.mubr.msk.f32.mxu1 %vm649_vm2, %v4196_v27  ;;  %v3830_v27 = vpack.c.bf16 %v3326_v26, %v3325_v25 }
 0x323   : > { %v861_v18 = vpop.trf.xlu1 }
 0x324   : > { %3553 = vmatmul.mubr.msk.f32.vlgmr.msra.gmra.mrb[2].mxu0 %vm877_vm6, %v861_v18 }
 0x325   : > { %3814 = vmatpush3.bf16.msra.mxu0 %v3813_v15  ;;  %3574 = vmatprep.mubr.msk.f32.mxu0 %vm4004_vm0, %v4005_v2 }
 0x326   : > { %3815 = vmatprep.subr.bf16.mxu0 %v4003_v1 }
 0x329   : > { %3818 = vmatpush3.bf16.msk.msra.mxu0 %vm4250_vm5, %v3816_v20 }
 0x32a   : > { %3826 = vmatprep.subr.bf16.mxu0 %v4003_v1 }
 0x32c   : > { %3575 = vmatmul.mubr.msk.f32.vlgmr.msra.gmra.mrb[4].mxu0 %vm877_vm6, %v861_v18 }
 0x32d   : > { %3828 = vmatpush3.bf16.msra.mxu0 %v3827_v24  ;;  %3596 = vmatprep.mubr.msk.f32.mxu0 %vm4004_vm0, %v4005_v2 }
 0x32e   : > { %3829 = vmatprep.subr.bf16.mxu0 %v4003_v1 }
 0x331   : > { %3832 = vmatpush3.bf16.msk.msra.mxu0 %vm4250_vm5, %v3830_v27 }
 0x332   : > { %3840 = vmatprep.subr.bf16.mxu0 %v4003_v1 }
 0x334   : > { %3597 = vmatmul.mubr.msk.f32.vlgmr.msra.gmra.mrb[6].mxu0 %vm877_vm6, %v861_v18 }
 0x335   : > { %3842 = vmatpush3.bf16.msra.mxu0 %v3841_v30  ;;  %3618 = vmatprep.mubr.msk.f32.mxu0 %vm4004_vm0, %v4005_v2 }
 0x336   : > { %3843 = vmatprep.subr.bf16.mxu0 %v4003_v1 }
 0x339   : > { %3846 = vmatpush3.bf16.msk.msra.mxu0 %vm4250_vm5, %v3844_v35  ;;  %v3340_v35 = vld [vmem:[%s4672_s10 + $0x3] ss:$0 sm:$0xff] }
 0x33a   : > { %3854 = vmatprep.subr.bf16.mxu0 %v4003_v1 }
 0x33c   : > { %3619 = vmatmul.mubr.msk.f32.vlgmr.msra.gmra.mrb[8].mxu0 %vm877_vm6, %v861_v18 }
 0x33d   : > { %3856 = vmatpush3.bf16.msra.mxu0 %v3855_v38  ;;  %3640 = vmatprep.mubr.msk.f32.mxu0 %vm4004_vm0, %v4005_v2 }
 0x33e   : > { %3857 = vmatprep.subr.bf16.mxu0 %v4003_v1 }
 0x341   : > { %3860 = vmatpush3.bf16.msk.msra.mxu0 %vm4250_vm5, %v3858_v41 }
 0x342   : > { %3868 = vmatprep.subr.bf16.mxu0 %v4003_v1 }
 0x344   : > { %3641 = vmatmul.mubr.msk.f32.vlgmr.msra.gmra.mrb[10].mxu0 %vm877_vm6, %v861_v18  ;;  %v3306_v18 = vld [vmem:[%s4672_s10] ss:$0 sm:$0xff] }
 0x345   : > { %3870 = vmatpush3.bf16.msra.mxu0 %v3869_v46  ;;  %3658 = vmatprep.mubr.msk.f32.mxu0 %vm4004_vm0, %v4005_v2 }
 0x348   : > { %3659 = vmatmul.mubr.msk.f32.vlgmr.msra.gmra.mrb[12].mxu0 %vm561_vm1, %v4135_v9 }
 0x349   : > { %3670 = vmatprep.mubr.msk.f32.mxu0 %vm561_vm1, %v4210_v33  ;;  %v1323_v33 = vpop.permute.xlu0 %1322 }
 0x34d   : > { %v4431_v63 = vpop.permute.xlu0 %2642 }
 0x351   : > { %v1500_v6 = vpop.permute.xlu0 %1499 }
 0x355   : > { %v4434_v11 = vpop.permute.xlu0 %2839 }
 0x359   : > { %v1677_v13 = vpop.permute.xlu0 %1676 }
 0x37f   : > { %v1037_v55 = vpop.f32.mrb[6].mxu1 }
 0x380   : > { %v1038_v56 = vadd.f32 %v1037_v55, %v963_v51  ;;  %v3565_v57 = vpop.f32.mrb[7].mxu1 }
 0x382   : > { %v1041_v9 = vpack.c.bf16 %v1038_v56, %v1038_v56 }
 0x384   : > { %1043 = vst.msk [vmem:[#allocation3] sm:$0x7] %vm1042_vm10, %v1041_v9 }
 0x387   : > { %v1217_v59 = vpop.f32.mrb[8].mxu1 }
 0x388   : > { %v1218_v60 = vadd.f32 %v1217_v59, %v1146_v54  ;;  %v3587_v61 = vpop.f32.mrb[9].mxu1 }
 0x38a   : > { %v1221_v62 = vpack.c.bf16 %v1218_v60, %v1218_v60 }
 0x38c   : > { %1223 = vst.msk [vmem:[#allocation3 + $0x4] sm:$0x7] %vm1042_vm10, %v1221_v62 }
 0x38f   : > { %v1394_v0 = vpop.f32.mrb[10].mxu1 }
 0x390   : > { %v1395_v3 = vadd.f32 %v1394_v0, %v1323_v33  ;;  %v3609_v4 = vpop.f32.mrb[11].mxu1  ;;  %v2040_v0 = vld [vmem:[%s4669_s7] sm:$0x3f] }
 0x392   : > { %v1398_v5 = vpack.c.bf16 %v1395_v3, %v1395_v3 }
 0x394   : > { %1400 = vst.msk [vmem:[#allocation3 + $0x8] sm:$0x7] %vm1042_vm10, %v1398_v5 }
 0x397   : > { %v1571_v7 = vpop.f32.mrb[12].mxu1 }
 0x398   : > { %v1572_v8 = vadd.f32 %v1571_v7, %v1500_v6  ;;  %v3631_v10 = vpop.f32.mrb[13].mxu1 }
 0x39a   : > { %v1575_v12 = vpack.c.bf16 %v1572_v8, %v1572_v8 }
 0x39c   : > { %1577 = vst.msk [vmem:[#allocation3 + $0xc] sm:$0x7] %vm1042_vm10, %v1575_v12 }
 0x39f   : > { %v1748_v14 = vpop.f32.mrb[14].mxu1 }
 0x3a0   : > { %v1749_v15 = vadd.f32 %v1748_v14, %v1677_v13  ;;  %v3653_v16 = vpop.f32.mrb[15].mxu1 }
 0x3a2   : > { %v1752_v17 = vpack.c.bf16 %v1749_v15, %v1749_v15 }
 0x3a4   : > { %1754 = vst.msk [vmem:[#allocation3 + $0x10] sm:$0x7] %vm1042_vm10, %v1752_v17 }
 0x3f7   : > { %v951_v19 = vpop.f32.mrb[2].mxu0 }
 0x3f8   : > { %v952_v20 = vadd.f32 %v3306_v18, %v951_v19  ;;  %v3554_v21 = vpop.f32.mrb[3].mxu0 }
 0x3fa   : > { %v955_v22 = vpack.c.bf16 %v952_v20, %v952_v20 }
 0x3fc   : > { %957 = vst.msk [vmem:[#allocation2] sm:$0xf] %vm956_vm11, %v955_v22 }
 0x3ff   : > { %v1132_v24 = vpop.f32.mrb[4].mxu0 }
 0x400   : > { %v1133_v25 = vadd.f32 %v3316_v23, %v1132_v24  ;;  %v3576_v26 = vpop.f32.mrb[5].mxu0 }
 0x402   : > { %v1136_v27 = vpack.c.bf16 %v1133_v25, %v1133_v25 }
 0x403   : > { %v2126_v8 = vld [vmem:[#allocation2] sm:$0xf] }
 0x404   : > { %1138 = vst.msk [vmem:[#allocation2 + $0x4] sm:$0xf] %vm956_vm11, %v1136_v27 }
 0x407   : > { %v1309_v29 = vpop.f32.mrb[6].mxu0 }
 0x408   : > { %v1310_v30 = vadd.f32 %v3328_v28, %v1309_v29  ;;  %v3598_v31 = vpop.f32.mrb[7].mxu0 }
 0x409   : > { %v2186_v31 = vld [vmem:[#allocation3] sm:$0xf] }
 0x40a   : > { %v1313_v34 = vpack.c.bf16 %v1310_v30, %v1310_v30 }
 0x40c   : > { %1315 = vst.msk [vmem:[#allocation2 + $0x8] sm:$0xf] %vm956_vm11, %v1313_v34 }
 0x40f   : > { %v1486_v36 = vpop.f32.mrb[8].mxu0 }
 0x410   : > { %v1487_v37 = vadd.f32 %v3340_v35, %v1486_v36  ;;  %v3620_v38 = vpop.f32.mrb[9].mxu0  ;;  %v3376_v35 = vld [vmem:[%s4669_s7 + $0x10] sm:$0x3f] }
 0x412   : > { %v1490_v39 = vpack.c.bf16 %v1487_v37, %v1487_v37  ;;  %v2235_v37 = vlaneseq }
 0x414   : > { %1492 = vst.msk [vmem:[#allocation2 + $0xc] sm:$0xf] %vm956_vm11, %v1490_v39 }
 0x417   : > { %v1663_v41 = vpop.f32.mrb[10].mxu0 }
 0x418   : > { %v1664_v46 = vadd.f32 %v3352_v40, %v1663_v41  ;;  %v3642_v51 = vpop.f32.mrb[11].mxu0  ;;  %v2236_v41 = vshrl.u32 %v2235_v37, 7 }
 0x41a   : > { %v1667_v54 = vpack.c.bf16 %v1664_v46, %v1664_v46  ;;  %v4549_v46 = vsub.s32 6, %v2236_v41 }
 0x41b   : > { %v1837_v55 = vpop.f32.mrb[12].mxu0 }
 0x41c   : > { %1669 = vst.msk [vmem:[#allocation2 + $0x10] sm:$0xf] %vm956_vm11, %v1667_v54  ;;  %v1838_v56 = vadd.f32 %v1837_v55, %v4417_v47  ;;  %v3660_v57 = vpop.f32.mrb[13].mxu0 }
 0x41e   : > { %3661 = vmatprep.subr.mxu1 %v1838_v56 }
 0x41f   : > { %3662 = vmatpush3.msra.mxu1 %v1838_v56 }
 0x420   : > { %3664 = vmatmul.mubr.msk.f32.vlgmr.msra.gmra.mrb[16].mxu1 %vm649_vm2, %v4203_v32  ;;  %3875 = vmatprep.subr.bf16.mxu1 %v4003_v1  ;;  %v1940_v32 = vld [vmem:[%s4668_s6 + $0x18] sm:$0x3f] }
 0x421   : > { %3684 = vmatprep.mubr.msk.f32.mxu1 %vm4004_vm0, %v4005_v2 }
 0x4f3   : > { %v3665_v9 = vpop.f32.mrb[16].mxu1 }
 0x4f4   : > { %v1934_v33 = vadd.f32 %v3665_v9, %v4421_v49  ;;  %v1928_v59 = vpop.f32.mrb[17].mxu1 }
 0x4f5   : > { %v1929_v60 = vadd.f32 %v1928_v59, %v4419_v48 }
 0x4f6   : > { %v1942_v61 = vadd.f32 %v1934_v33, %v4402_v45 }
 0x4f7   : > { %v1941_v47 = vadd.f32 %v1929_v60, %v4400_v42 }
 0x4f9   : > { %v3871_v62 = vpack.c.bf16 %v1942_v61, %v1941_v47 }
 0x4fb   : > { %3872 = vmatprep.subr.bf16.mxu0 %v3871_v62 }
 0x4fc   : > { %3874 = vmatpush3.bf16.msra.mxu0 %v3871_v62 }
 0x4fd   : > { %3687 = vmatprep.subr.bf16.mxu0 %v4005_v2 }
 0x4ff   : > { %3671 = vmatmul.mubr.msk.f32.vlgmr.msra.gmra.mrb[14].mxu0 %vm561_vm1, %v4219_v43 }
 0x500   : > { %3673 = vmatprep.mubr.msk.f32.mxu0 %vm561_vm1, %v4224_v44 }
 0x503   : > { %3674 = vmatmul.mubr.msk.f32.gmra.mrb[16].mxu0 %vm561_vm1, %v1940_v32 }
 0x504   : > { %3689 = vmatprep.mubr.msk.bf16.mxu0 %vm4004_vm0, %v4005_v2 }
 0x5d2   : > { %v4479_v42 = vpop.f32.mrb[14].mxu0 }
 0x5d3   : > { %v4481_v45 = vpop.f32.mrb[15].mxu0 }
 0x5d4   : > { %v4485_v48 = vpack.c.bf16 %v4479_v42, %v4481_v45 }
 0x5d6   : > { %v4487_v43 = vpop.f32.mrb[16].mxu0  ;;  %3877 = vmatpush3.bf16.msra.mxu1 %v4485_v48 }
 0x5d7   : > { %v4490_v44 = vpop.f32.mrb[17].mxu0  ;;  %3878 = vmatprep.subr.bf16.mxu1 %v4003_v1 }
 0x5d8   : > { %v4495_v49 = vpack.c.bf16 %v4487_v43, %v4490_v44 }
 0x5da   : > { %3881 = vmatpush3.bf16.msk.msra.mxu1 %vm4250_vm5, %v4495_v49 }
 0x5db   : > { %3693 = vmatprep.subr.bf16.mxu1 %v4005_v2 }
 0x5dd   : > { %3685 = vmatmul.mubr.msk.f32.vlgmr.msra.gmra.mrb[18].mxu1 %vm877_vm6, %v2040_v0 }
 0x5de   : > { %3695 = vmatprep.mubr.msk.bf16.mxu1 %vm4004_vm0, %v4005_v2 }
 0x6b0   : > { %v2121_v3 = vpop.f32.mrb[18].mxu1 }
 0x6b1   : > { %v2122_v4 = vadd.f32 %v2121_v3, %v4423_v50  ;;  %v3686_v5 = vpop.f32.mrb[19].mxu1  ;;  %v3370_v50 = vld [vmem:[%s4669_s7 + $0x8] sm:$0x3f] }
 0x6b3   : > { %v2125_v6 = vpack.c.bf16 %v2122_v4, %v2122_v4 }
 0x6b5   : > { %v2133_v7 = vsel %vm2131_vm12, %v2125_v6, 0 }
 0x6b6   : > { %3688 = vmatpush3.bf16.msra.mxu0 %v2133_v7 }
 0x6b7   : > { %3882 = vmatprep.subr.bf16.mxu0 %v4003_v1 }
 0x6b9   : > { %3690 = vmatmul.mubr.msk.bf16.vlgmr.msra.gmra.mrb[20].mxu0 %vm2127_vm13, %v2126_v8 }
 0x6ba   : > { %3884 = vmatpush3.bf16.msra.mxu0 %v4485_v48  ;;  %3707 = vmatprep.mubr.msk.f32.mxu0 %vm4004_vm0, %v4005_v2 }
 0x6bb   : > { %3885 = vmatprep.subr.bf16.mxu0 %v4003_v1 }
 0x6be   : > { %3888 = vmatpush3.bf16.msk.msra.mxu0 %vm4250_vm5, %v4495_v49 }
 0x6bf   : > { %3716 = vmatprep.subr.bf16.mxu0 %v4005_v2 }
 0x6c1   : > { %3708 = vmatmul.mubr.msk.f32.vlgmr.msra.gmra.mrb[18].mxu0 %vm877_vm6, %v3370_v50 }
 0x6c2   : > { %3718 = vmatprep.mubr.msk.bf16.mxu0 %vm4004_vm0, %v4005_v2 }
 0x78c   : > { %v2169_v10 = vpop.f32.mrb[20].mxu0 }
 0x78d   : > { %v2175_v12 = vsel %vm649_vm2, %v2169_v10, -inf  ;;  %v3691_v13 = vpop.f32.mrb[21].mxu0 }
 0x78e   : > { %v2176_v14 = vrot.slane %v2175_v12, 4  ;;  %v2172_v15 = vpop.f32.mrb[22].mxu0  ;;  %v2385_v13 = vld [vmem:[#allocation3 + $0x4] sm:$0xf] }
 0x78f   : > { %v3692_v16 = vpop.f32.mrb[23].mxu0  ;;  %v3382_v15 = vld [vmem:[%s4669_s7 + $0x18] sm:$0x3f] }
 0x790   : > { %v2177_v17 = vmax.f32 %v2175_v12, %v2176_v14 }
 0x792   : > { %v2178_v18 = vrot.slane %v2177_v17, 2 }
 0x794   : > { %v2179_v19 = vmax.f32 %v2177_v17, %v2178_v18  ;;  %v2320_v20 = vpop.f32.mrb[18].mxu0 }
 0x795   : > { %v3709_v21 = vpop.f32.mrb[19].mxu0  ;;  %v2321_v26 = vadd.f32 %v2320_v20, %v4425_v53  ;;  %v2326_v53 = vld [vmem:[#allocation2 + $0x4] sm:$0xf] }
 0x796   : > { %v2180_v22 = vrot.slane %v2179_v19, 1 }
 0x797   : > { %v2324_v29 = vpack.c.bf16 %v2321_v26, %v2321_v26 }
 0x798   : > { %v2181_v23 = vmax.f32 %v2179_v19, %v2180_v22 }
 0x799   : > { %v2331_v34 = vsel %vm2131_vm12, %v2324_v29, 0 }
 0x79a   : > { %v2182_v24 = vsub.f32 %v2169_v10, %v2181_v23 }
 0x79c   : > { %v2183_v25 = vmul.f32 1.442695, %v2182_v24 }
 0x79e   : > { %3941 = vpow2.f32 %v2183_v25 }
 0x7a8   : > { %v3942_v27 = vpop.eup %3941 }
 0x7a9   : > { %v2185_v28 = vpack.c.bf16 %v3942_v27, %v3942_v27 }
 0x7ab   : > { %v2192_v30 = vsel %vm2190_vm14, %v2185_v28, 0 }
 0x7ac   : > { %3694 = vmatpush3.bf16.msra.mxu1 %v2192_v30 }
 0x7ad   : > { %3710 = vmatprep.subr.bf16.mxu1 %v4005_v2 }
 0x7af   : > { %3696 = vmatmul.mubr.msk.bf16.vlgmr.msra.gmra.mrb[20].mxu1 %vm649_vm2, %v2186_v31 }
 0x7b0   : > { %3711 = vmatpush3.bf16.msra.mxu1 %v2331_v34  ;;  %3712 = vmatprep.mubr.msk.bf16.mxu1 %vm4004_vm0, %v4005_v2 }
 0x7b1   : > { %3889 = vmatprep.subr.bf16.mxu1 %v4003_v1 }
 0x7b7   : > { %3713 = vmatmul.mubr.msk.bf16.vlgmr.msra.gmra.mrb[24].mxu1 %vm2127_vm13, %v2326_v53 }
 0x7b8   : > { %3891 = vmatpush3.bf16.msra.mxu1 %v4485_v48  ;;  %3730 = vmatprep.mubr.msk.f32.mxu1 %vm4004_vm0, %v4005_v2 }
 0x7b9   : > { %3892 = vmatprep.subr.bf16.mxu1 %v4003_v1 }
 0x7bc   : > { %3895 = vmatpush3.bf16.msk.msra.mxu1 %vm4250_vm5, %v4495_v49 }
 0x7bd   : > { %3739 = vmatprep.subr.bf16.mxu1 %v4005_v2 }
 0x7bf   : > { %3731 = vmatmul.mubr.msk.f32.vlgmr.msra.gmra.mrb[28].mxu1 %vm877_vm6, %v3376_v35 }
 0x7c0   : > { %3741 = vmatprep.mubr.msk.bf16.mxu1 %vm4004_vm0, %v4005_v2 }
 0x882   : > { %v2228_v36 = vpop.f32.mrb[20].mxu1 }
 0x883   : > { %3943 = vrcp.f32 %v2228_v36  ;;  %v3697_v38 = vpop.f32.mrb[21].mxu1 }
 0x884   : > { %v2231_v39 = vpop.f32.mrb[22].mxu1 }
 0x885   : > { %v3698_v40 = vpop.f32.mrb[23].mxu1 }
 0x88a   : > { %v2367_v51 = vpop.f32.mrb[24].mxu1 }
 0x88b   : > { %v2373_v54 = vsel %vm649_vm2, %v2367_v51, -inf  ;;  %v3714_v55 = vpop.f32.mrb[25].mxu1 }
 0x88c   : > { %v2374_v56 = vrot.slane %v2373_v54, 4  ;;  %v2370_v57 = vpop.f32.mrb[26].mxu1  ;;  %v2582_v55 = vld [vmem:[#allocation3 + $0x8] sm:$0xf] }
 0x88d   : > { %v3944_v9 = vpop.eup %3943  ;;  %v3715_v33 = vpop.f32.mrb[27].mxu1  ;;  %v3388_v57 = vld [vmem:[%s4669_s7 + $0x20] sm:$0x3f] }
 0x88e   : > { %v2238_v59 = vrot.slane %v3944_v9, %v4549_v46  ;;  %v2375_v60 = vmax.f32 %v2373_v54, %v2374_v56  ;;  %v3395_v9 = vmul.f32 -1.442695, %v4479_v42 }
 0x890   : > { %v2239_v61 = vmul.f32 %v2238_v59, %v2228_v36  ;;  %v2376_v47 = vrot.slane %v2375_v60, 2 }
 0x892   : > { %2241 = vst.msk [vmem:[#allocation4] sm:$0x3f] %vm2240_vm15, %v2239_v61  ;;  %v2377_v62 = vmax.f32 %v2375_v60, %v2376_v47  ;;  %v2517_v32 = vpop.f32.mrb[28].mxu1 }
 0x893   : > { %v3732_v0 = vpop.f32.mrb[29].mxu1  ;;  %v2518_v7 = vadd.f32 %v2517_v32, %v4427_v58  ;;  %v2523_v58 = vld [vmem:[#allocation2 + $0x8] sm:$0xf] }
 0x894   : > { %v2378_v3 = vrot.slane %v2377_v62, 1 }
 0x895   : > { %v2521_v10 = vpack.c.bf16 %v2518_v7, %v2518_v7 }
 0x896   : > { %v2379_v4 = vmax.f32 %v2377_v62, %v2378_v3 }
 0x897   : > { %v2528_v14 = vsel %vm2131_vm12, %v2521_v10, 0 }
 0x898   : > { %v2380_v5 = vsub.f32 %v2367_v51, %v2379_v4 }
 0x89a   : > { %v2381_v6 = vmul.f32 1.442695, %v2380_v5 }
 0x89c   : > { %3945 = vpow2.f32 %v2381_v6 }
 0x8a6   : > { %v3946_v8 = vpop.eup %3945 }
 0x8a7   : > { %v2383_v50 = vpack.c.bf16 %v3946_v8, %v3946_v8 }
 0x8a9   : > { %v2390_v12 = vsel %vm2190_vm14, %v2383_v50, 0 }
 0x8aa   : > { %3717 = vmatpush3.bf16.msra.mxu0 %v2390_v12 }
 0x8ab   : > { %3733 = vmatprep.subr.bf16.mxu0 %v4005_v2 }
 0x8ad   : > { %3719 = vmatmul.mubr.msk.bf16.vlgmr.msra.gmra.mrb[24].mxu0 %vm649_vm2, %v2385_v13 }
 0x8ae   : > { %3734 = vmatpush3.bf16.msra.mxu0 %v2528_v14  ;;  %3735 = vmatprep.mubr.msk.bf16.mxu0 %vm4004_vm0, %v4005_v2 }
 0x8af   : > { %3896 = vmatprep.subr.bf16.mxu0 %v4003_v1 }
 0x8b5   : > { %3736 = vmatmul.mubr.msk.bf16.vlgmr.msra.gmra.mrb[28].mxu0 %vm2127_vm13, %v2523_v58 }
 0x8b6   : > { %3898 = vmatpush3.bf16.msra.mxu0 %v4485_v48  ;;  %3753 = vmatprep.mubr.msk.f32.mxu0 %vm4004_vm0, %v4005_v2 }
 0x8b7   : > { %3899 = vmatprep.subr.bf16.mxu0 %v4003_v1 }
 0x8ba   : > { %3902 = vmatpush3.bf16.msk.msra.mxu0 %vm4250_vm5, %v4495_v49 }
 0x8bb   : > { %3762 = vmatprep.subr.bf16.mxu0 %v4005_v2 }
 0x8bd   : > { %3754 = vmatmul.mubr.msk.f32.vlgmr.msra.gmra.mrb[32].mxu0 %vm877_vm6, %v3382_v15 }
 0x8be   : > { %3764 = vmatprep.mubr.msk.bf16.mxu0 %vm4004_vm0, %v4005_v2 }
 0x980   : > { %v2426_v16 = vpop.f32.mrb[24].mxu0 }
 0x981   : > { %3947 = vrcp.f32 %v2426_v16  ;;  %v3720_v17 = vpop.f32.mrb[25].mxu0 }
 0x982   : > { %v2429_v18 = vpop.f32.mrb[26].mxu0 }
 0x983   : > { %v3721_v19 = vpop.f32.mrb[27].mxu0 }
 0x988   : > { %v2564_v20 = vpop.f32.mrb[28].mxu0 }
 0x989   : > { %v2570_v21 = vsel %vm649_vm2, %v2564_v20, -inf  ;;  %v3737_v22 = vpop.f32.mrb[29].mxu0 }
 0x98a   : > { %v2571_v23 = vrot.slane %v2570_v21, 4  ;;  %v2567_v24 = vpop.f32.mrb[30].mxu0 }
 0x98b   : > { %v3948_v25 = vpop.eup %3947  ;;  %v3738_v26 = vpop.f32.mrb[31].mxu0 }
 0x98c   : > { %v2436_v27 = vrot.slane %v3948_v25, %v4549_v46  ;;  %v2572_v28 = vmax.f32 %v2570_v21, %v2571_v23 }
 0x98e   : > { %v2437_v29 = vmul.f32 %v2436_v27, %v2426_v16  ;;  %v2573_v30 = vrot.slane %v2572_v28, 2 }
 0x990   : > { %2438 = vst.msk [vmem:[#allocation4 + $0x6] sm:$0x3f] %vm2240_vm15, %v2437_v29  ;;  %v2574_v31 = vmax.f32 %v2572_v28, %v2573_v30  ;;  %v2714_v34 = vpop.f32.mrb[32].mxu0 }
 0x991   : > { %v3755_v53 = vpop.f32.mrb[33].mxu0  ;;  %v2715_v39 = vadd.f32 %v2714_v34, %v4431_v63  ;;  %v2720_v63 = vld [vmem:[#allocation2 + $0xc] sm:$0xf] }
 0x992   : > { %v2575_v35 = vrot.slane %v2574_v31, 1 }
 0x993   : > { %v2718_v51 = vpack.c.bf16 %v2715_v39, %v2715_v39 }
 0x994   : > { %v2576_v36 = vmax.f32 %v2574_v31, %v2575_v35 }
 0x995   : > { %v2725_v56 = vsel %vm2131_vm12, %v2718_v51, 0 }
 0x996   : > { %v2577_v37 = vsub.f32 %v2564_v20, %v2576_v36 }
 0x997   : > { %v3030_v17 = vld [vmem:[#allocation4] sm:$0xff] }
 0x998   : > { %v2578_v38 = vmul.f32 1.442695, %v2577_v37 }
 0x99a   : > { %3949 = vpow2.f32 %v2578_v38 }
 0x9a4   : > { %v3950_v40 = vpop.eup %3949 }
 0x9a5   : > { %v2580_v41 = vpack.c.bf16 %v3950_v40, %v3950_v40 }
 0x9a7   : > { %v2587_v54 = vsel %vm2190_vm14, %v2580_v41, 0  ;;  %v2779_v41 = vld [vmem:[#allocation3 + $0xc] sm:$0xf] }
 0x9a8   : > { %3740 = vmatpush3.bf16.msra.mxu1 %v2587_v54  ;;  %v2917_v54 = vld [vmem:[#allocation2 + $0x10] sm:$0xf] }
 0x9a9   : > { %3756 = vmatprep.subr.bf16.mxu1 %v4005_v2 }
 0x9ab   : > { %3742 = vmatmul.mubr.msk.bf16.vlgmr.msra.gmra.mrb[32].mxu1 %vm649_vm2, %v2582_v55 }
 0x9ac   : > { %3757 = vmatpush3.bf16.msra.mxu1 %v2725_v56  ;;  %3758 = vmatprep.mubr.msk.bf16.mxu1 %vm4004_vm0, %v4005_v2 }
 0x9ad   : > { %3903 = vmatprep.subr.bf16.mxu1 %v4003_v1 }
 0x9b3   : > { %3759 = vmatmul.mubr.msk.bf16.vlgmr.msra.gmra.mrb[36].mxu1 %vm2127_vm13, %v2720_v63 }
 0x9b4   : > { %3905 = vmatpush3.bf16.msra.mxu1 %v4485_v48  ;;  %3776 = vmatprep.mubr.msk.f32.mxu1 %vm4004_vm0, %v4005_v2  ;;  %v3394_v48 = vmul.f32 -1.442695, %v4481_v45 }
 0x9b5   : > { %3906 = vmatprep.subr.bf16.mxu1 %v4003_v1 }
 0x9b6   : > { %3951 = vpow2.f32 %v3394_v48 }
 0x9b7   : > { %3953 = vpow2.f32 %v3395_v9 }
 0x9b8   : > { %3909 = vmatpush3.bf16.msk.msra.mxu1 %vm4250_vm5, %v4495_v49 }
 0x9b9   : > { %3785 = vmatprep.subr.bf16.mxu1 %v4005_v2 }
 0x9bb   : > { %3777 = vmatmul.mubr.msk.f32.vlgmr.msra.gmra.mrb[30].mxu1 %vm877_vm6, %v3388_v57 }
 0x9bc   : > { %3787 = vmatprep.mubr.msk.bf16.mxu1 %vm4004_vm0, %v4005_v2 }
 0x9c0   : > { %v3952_v1 = vpop.eup %3951 }
 0x9c1   : > { %v3046_v52 = vadd.f32 1.0, %v3952_v1  ;;  %v3954_v49 = vpop.eup %3953 }
 0x9c2   : > { %v3047_v33 = vadd.f32 1.0, %v3954_v49 }
 0x9c3   : > { %3955 = vrcp.f32 %v3046_v52 }
 0x9cd   : > { %v3956_v32 = vpop.eup %3955 }
 0x9ce   : > { %v3058_v8 = vsub.f32 1.0, %v3956_v32  ;;  %vm3062_vm1 = vcmp.gt.f32.partialorder %v3956_v32, 0.1 }
 0x9d0   : > { %vm3070_vm3 = vcmp.gt.f32.partialorder %v3058_v8, 0.1  ;;  %v3066_v20 = vsel %vm3062_vm1, %v3058_v8, 0.0 }
 0x9d1   : > { %v3074_v21 = vsel %vm3070_vm3, %v3058_v8, 0.0  ;;  %v3078_v25 = vmul.f32 %v3066_v20, %v4481_v45  ;;  %v2976_v20 = vld [vmem:[#allocation3 + $0x10] sm:$0xf] }
 0x9d2   : > { %v3082_v22 = vmul.f32 %v3074_v21, %v3030_v17  ;;  %v3397_v21 = vmul.f32 -1.442695, %v4487_v43 }
 0x9d4   : > { %v4610_v30 = vadd.f32 %v3082_v22, %v3078_v25 }
 0x9d6   : > { %v3090_v35 = vsel %vm649_vm2, %v4610_v30, 0.0 }
 0xa7e   : > { %v2623_v59 = vpop.f32.mrb[32].mxu1 }
 0xa7f   : > { %3957 = vrcp.f32 %v2623_v59  ;;  %v3743_v60 = vpop.f32.mrb[33].mxu1 }
 0xa80   : > { %v2626_v61 = vpop.f32.mrb[34].mxu1  ;;  %3959 = vrcp.f32 %v3047_v33 }
 0xa81   : > { %v3744_v47 = vpop.f32.mrb[35].mxu1 }
 0xa86   : > { %v2761_v62 = vpop.f32.mrb[36].mxu1 }
 0xa87   : > { %v2767_v0 = vsel %vm649_vm2, %v2761_v62, -inf  ;;  %v3760_v3 = vpop.f32.mrb[37].mxu1 }
 0xa88   : > { %v2768_v4 = vrot.slane %v2767_v0, 4  ;;  %v2764_v5 = vpop.f32.mrb[38].mxu1 }
 0xa89   : > { %v3958_v6 = vpop.eup %3957  ;;  %v3761_v7 = vpop.f32.mrb[39].mxu1 }
 0xa8a   : > { %v2633_v50 = vrot.slane %v3958_v6, %v4549_v46  ;;  %v2769_v10 = vmax.f32 %v2767_v0, %v2768_v4  ;;  %v3960_v12 = vpop.eup %3959 }
 0xa8b   : > { %v3059_v58 = vsub.f32 1.0, %v3960_v12  ;;  %vm3063_vm4 = vcmp.gt.f32.partialorder %v3960_v12, 0.1 }
 0xa8c   : > { %v2634_v13 = vmul.f32 %v2633_v50, %v2623_v59  ;;  %v2770_v14 = vrot.slane %v2769_v10, 2 }
 0xa8d   : > { %vm3071_vm5 = vcmp.gt.f32.partialorder %v3059_v58, 0.1  ;;  %v3067_v24 = vsel %vm3063_vm4, %v3059_v58, 0.0 }
 0xa8e   : > { %2635 = vst.msk [vmem:[#allocation4 + $0xc] sm:$0x3f] %vm2240_vm15, %v2634_v13  ;;  %v2771_v15 = vmax.f32 %v2769_v10, %v2770_v14  ;;  %v2911_v16 = vpop.f32.mrb[30].mxu1  ;;  %v3075_v27 = vsel %vm3071_vm5, %v3059_v58, 0.0  ;;  %v3079_v29 = vmul.f32 %v4479_v42, %v3067_v24 }
 0xa8f   : > { %v3778_v18 = vpop.f32.mrb[31].mxu1  ;;  %v2912_v45 = vadd.f32 %v2911_v16, %v4434_v11  ;;  %v3396_v11 = vmul.f32 -1.442695, %v4490_v44 }
 0xa90   : > { %v2772_v19 = vrot.slane %v2771_v15, 1 }
 0xa91   : > { %v2915_v40 = vpack.c.bf16 %v2912_v45, %v2912_v45 }
 0xa92   : > { %v2773_v23 = vmax.f32 %v2771_v15, %v2772_v19 }
 0xa93   : > { %v2922_v51 = vsel %vm2131_vm12, %v2915_v40, 0 }
 0xa94   : > { %v2774_v26 = vsub.f32 %v2761_v62, %v2773_v23 }
 0xa95   : > { %v3031_v28 = vld [vmem:[#allocation4 + $0x8] sm:$0xff] }
 0xa96   : > { %v3083_v31 = vmul.f32 %v3075_v27, %v3031_v28  ;;  %v2775_v34 = vmul.f32 1.442695, %v2774_v26 }
 0xa98   : > { %v4612_v53 = vadd.f32 %v3083_v31, %v3079_v29  ;;  %3961 = vpow2.f32 %v2775_v34 }
 0xa99   : > { %3963 = vpow2.f32 %v3396_v11 }
 0xa9a   : > { %v3091_v36 = vsel %vm649_vm2, %v4612_v53, 0.0 }
 0xa9b   : > { %v3092_v37 = vadd.f32 %v3091_v36, %v3090_v35 }
 0xaa2   : > { %v3962_v38 = vpop.eup %3961 }
 0xaa3   : > { %v2777_v39 = vpack.c.bf16 %v3962_v38, %v3962_v38  ;;  %v3964_v55 = vpop.eup %3963 }
 0xaa4   : > { %v3048_v56 = vadd.f32 1.0, %v3964_v55 }
 0xaa5   : > { %v2784_v42 = vsel %vm2190_vm14, %v2777_v39, 0 }
 0xaa6   : > { %3763 = vmatpush3.bf16.msra.mxu0 %v2784_v42 }
 0xaa7   : > { %3779 = vmatprep.subr.bf16.mxu0 %v4005_v2 }
 0xaa9   : > { %3765 = vmatmul.mubr.msk.bf16.vlgmr.msra.gmra.mrb[36].mxu0 %vm649_vm2, %v2779_v41 }
 0xaaa   : > { %3780 = vmatpush3.bf16.msra.mxu0 %v2922_v51  ;;  %3781 = vmatprep.mubr.msk.bf16.mxu0 %vm4004_vm0, %v4005_v2 }
 0xab1   : > { %3782 = vmatmul.mubr.msk.bf16.vlgmr.msra.gmra.mrb[40].mxu0 %vm2127_vm13, %v2917_v54 }
 0xb7c   : > { %v2820_v63 = vpop.f32.mrb[36].mxu0 }
 0xb7d   : > { %3965 = vrcp.f32 %v2820_v63  ;;  %v3766_v57 = vpop.f32.mrb[37].mxu0 }
 0xb7e   : > { %v2823_v48 = vpop.f32.mrb[38].mxu0  ;;  %3967 = vrcp.f32 %v3048_v56 }
 0xb7f   : > { %v3767_v9 = vpop.f32.mrb[39].mxu0 }
 0xb84   : > { %v2958_v1 = vpop.f32.mrb[40].mxu0 }
 0xb85   : > { %v2964_v52 = vsel %vm649_vm2, %v2958_v1, -inf  ;;  %v3783_v49 = vpop.f32.mrb[41].mxu0 }
 0xb86   : > { %v2965_v33 = vrot.slane %v2964_v52, 4  ;;  %v2961_v2 = vpop.f32.mrb[42].mxu0 }
 0xb87   : > { %v3966_v59 = vpop.eup %3965  ;;  %v3784_v60 = vpop.f32.mrb[43].mxu0 }
 0xb88   : > { %v2830_v61 = vrot.slane %v3966_v59, %v4549_v46  ;;  %v2966_v47 = vmax.f32 %v2964_v52, %v2965_v33  ;;  %v3968_v62 = vpop.eup %3967  ;;  %v3145_v59 = vpop.permute.xlu0 %3144 }
 0xb89   : > { %v3060_v3 = vsub.f32 1.0, %v3968_v62  ;;  %vm3064_vm0 = vcmp.gt.f32.partialorder %v3968_v62, 0.1 }
 0xb8a   : > { %v2831_v32 = vmul.f32 %v2830_v61, %v2820_v63  ;;  %v2967_v0 = vrot.slane %v2966_v47, 2 }
 0xb8b   : > { %vm3072_vm6 = vcmp.gt.f32.partialorder %v3060_v3, 0.1  ;;  %v3068_v7 = vsel %vm3064_vm0, %v3060_v3, 0.0 }
 0xb8c   : > { %2832 = vst.msk [vmem:[#allocation4 + $0x12] sm:$0x3f] %vm2240_vm15, %v2831_v32  ;;  %v2968_v4 = vmax.f32 %v2966_v47, %v2967_v0  ;;  %v3076_v50 = vsel %vm3072_vm6, %v3060_v3, 0.0  ;;  %v3080_v12 = vmul.f32 %v3068_v7, %v4490_v44 }
 0xb8e   : > { %v2969_v5 = vrot.slane %v2968_v4, 1 }
 0xb90   : > { %v2970_v6 = vmax.f32 %v2968_v4, %v2969_v5 }
 0xb92   : > { %v2971_v8 = vsub.f32 %v2958_v1, %v2970_v6 }
 0xb93   : > { %v3032_v10 = vld [vmem:[#allocation4 + $0x10] sm:$0xff] }
 0xb94   : > { %v3084_v13 = vmul.f32 %v3076_v50, %v3032_v10  ;;  %v2972_v14 = vmul.f32 1.442695, %v2971_v8 }
 0xb96   : > { %v3088_v58 = vadd.f32 %v3084_v13, %v3080_v12  ;;  %3969 = vpow2.f32 %v2972_v14 }
 0xb97   : > { %3971 = vpow2.f32 %v3397_v21 }
 0xb98   : > { %v3093_v15 = vsel %vm649_vm2, %v3088_v58, 0.0 }
 0xb99   : > { %v3094_v16 = vadd.f32 %v3093_v15, %v3092_v37 }
 0xba0   : > { %v3970_v17 = vpop.eup %3969 }
 0xba1   : > { %v2974_v18 = vpack.c.bf16 %v3970_v17, %v3970_v17  ;;  %v3972_v22 = vpop.eup %3971 }
 0xba2   : > { %v3049_v44 = vadd.f32 1.0, %v3972_v22 }
 0xba3   : > { %v2981_v19 = vsel %vm2190_vm14, %v2974_v18, 0  ;;  %v3140_v18 = vpop.permute.xlu1 %3139 }
 0xba4   : > { %3786 = vmatpush3.bf16.msra.mxu1 %v2981_v19 }
 0xba7   : > { %3788 = vmatmul.mubr.msk.bf16.vlgmr.msra.gmra.mrb[40].mxu1 %vm649_vm2, %v2976_v20 }
 0xc7a   : > { %v3017_v23 = vpop.f32.mrb[40].mxu1 }
 0xc7b   : > { %3973 = vrcp.f32 %v3017_v23  ;;  %v3789_v24 = vpop.f32.mrb[41].mxu1 }
 0xc7c   : > { %v3020_v25 = vpop.f32.mrb[42].mxu1  ;;  %3975 = vrcp.f32 %v3049_v44 }
 0xc7d   : > { %v3790_v26 = vpop.f32.mrb[43].mxu1 }
 0xc85   : > { %v3974_v27 = vpop.eup %3973 }
 0xc86   : > { %v3027_v28 = vrot.slane %v3974_v27, %v4549_v46  ;;  %v3976_v29 = vpop.eup %3975 }
 0xc87   : > { %v3061_v34 = vsub.f32 1.0, %v3976_v29  ;;  %vm3065_vm7 = vcmp.gt.f32.partialorder %v3976_v29, 0.1 }
 0xc88   : > { %v3028_v31 = vmul.f32 %v3027_v28, %v3017_v23 }
 0xc89   : > { %vm3073_vm8 = vcmp.gt.f32.partialorder %v3061_v34, 0.1  ;;  %v3069_v35 = vsel %vm3065_vm7, %v3061_v34, 0.0 }
 0xc8a   : > { %3029 = vst.msk [vmem:[#allocation4 + $0x18] sm:$0x3f] %vm2240_vm15, %v3028_v31  ;;  %v3077_v36 = vsel %vm3073_vm8, %v3061_v34, 0.0  ;;  %v3081_v45 = vmul.f32 %v4487_v43, %v3069_v35 }
 0xc91   : > { %v3033_v37 = vld [vmem:[#allocation4 + $0x18] sm:$0x3f] }
 0xc92   : > { %v3085_v38 = vmul.f32 %v3077_v36, %v3033_v37 }
 0xc94   : > { %v3089_v39 = vadd.f32 %v3085_v38, %v3081_v45 }
 0xc96   : > { %v3095_v40 = vsel %vm2240_vm15, %v3089_v39, 0.0 }
 0xc97   : > { %v3096_v42 = vadd.f32 %v3095_v40, %v3094_v16 }
 0xc99   : > { %v3097_v41 = vrot.slane %v3096_v42, 4 }
 0xc9b   : > { %v3098_v51 = vadd.f32 %v3097_v41, %v3096_v42 }
 0xc9d   : > { %v3099_v46 = vrot.slane %v3098_v51, 2 }
 0xc9f   : > { %v3100_v54 = vadd.f32 %v3099_v46, %v3098_v51 }
 0xca1   : > { %v3101_v11 = vrot.slane %v3100_v54, 1 }
 0xca3   : > { %v3102_v55 = vadd.f32 %v3101_v11, %v3100_v54 }
 0xca5   : > { %v3104_v56 = vmul.f32 0.033333335, %v3102_v55 }
 0xca7   : > { %v3105_v63 = vsub.f32 %v4610_v30, %v3104_v56  ;;  %v3106_v57 = vsub.f32 %v4612_v53, %v3104_v56  ;;  %v3107_v48 = vsub.f32 %v3088_v58, %v3104_v56  ;;  %v3108_v9 = vsub.f32 %v3089_v39, %v3104_v56  ;;  %v3150_v53 = vpop.permute.xlu0 %3149 }
 0xca9   : > { %v3109_v1 = vmul.f32 %v3105_v63, %v3105_v63  ;;  %v3110_v43 = vmul.f32 %v3106_v57, %v3106_v57  ;;  %v3111_v52 = vmul.f32 %v3107_v48, %v3107_v48  ;;  %v3112_v49 = vmul.f32 %v3108_v9, %v3108_v9 }
 0xcab   : > { %v3113_v33 = vsel %vm649_vm2, %v3109_v1, 0.0  ;;  %v3114_v2 = vsel %vm649_vm2, %v3110_v43, 0.0  ;;  %v3116_v61 = vsel %vm649_vm2, %v3111_v52, 0.0  ;;  %v3118_v62 = vsel %vm2240_vm15, %v3112_v49, 0.0  ;;  %v3155_v4 = vpop.permute.xlu0 %3154 }
 0xcac   : > { %v3115_v60 = vadd.f32 %v3114_v2, %v3113_v33 }
 0xcae   : > { %v3117_v47 = vadd.f32 %v3116_v61, %v3115_v60 }
 0xcaf   : > { %v3168_v8 = vpop.permute.xlu0 %3167 }
 0xcb0   : > { %v3119_v30 = vadd.f32 %v3118_v62, %v3117_v47 }
 0xcb2   : > { %v3120_v32 = vrot.slane %v3119_v30, 4 }
 0xcb3   : > { %v3173_v12 = vpop.permute.xlu0 %3172 }
 0xcb4   : > { %v3121_v0 = vadd.f32 %v3120_v32, %v3119_v30 }
 0xcb6   : > { %v3122_v3 = vrot.slane %v3121_v0, 2 }
 0xcb7   : > { %v3178_v13 = vpop.permute.xlu0 %3177 }
 0xcb8   : > { %v3123_v5 = vadd.f32 %v3122_v3, %v3121_v0 }
 0xcba   : > { %v3124_v6 = vrot.slane %v3123_v5, 1 }
 0xcbb   : > { %v3183_v44 = vpop.permute.xlu0 %3182 }
 0xcbc   : > { %v3125_v7 = vadd.f32 %v3124_v6, %v3123_v5 }
 0xcbe   : > { %v3126_v50 = vmul.f32 0.033333335, %v3125_v7 }
 0xcc0   : > { %v3127_v10 = vadd.f32 1e-05, %v3126_v50 }
 0xcc2   : > { %3977 = vrsqrt.f32 %v3127_v10 }
 0xccc   : > { %v3978_v14 = vpop.eup %3977 }
 0xccd   : > { %v3129_v58 = vmul.f32 %v3978_v14, %v3105_v63  ;;  %v3130_v15 = vmul.f32 %v3978_v14, %v3106_v57  ;;  %v3131_v16 = vmul.f32 %v3978_v14, %v3107_v48  ;;  %v3132_v17 = vmul.f32 %v3978_v14, %v3108_v9 }
 0xccf   : > { %v3157_v19 = vmul.f32 %v3140_v18, %v3129_v58  ;;  %v3158_v20 = vmul.f32 %v3145_v59, %v3130_v15  ;;  %v3159_v21 = vmul.f32 %v3150_v53, %v3131_v16  ;;  %v3160_v22 = vmul.f32 %v3155_v4, %v3132_v17 }
 0xcd1   : > { %v3185_v23 = vadd.f32 %v3168_v8, %v3157_v19  ;;  %v3186_v24 = vadd.f32 %v3173_v12, %v3158_v20  ;;  %v3187_v25 = vadd.f32 %v3178_v13, %v3159_v21  ;;  %v3188_v26 = vadd.f32 %v3183_v44, %v3160_v22 }
 0xcd3   : > { %3189 = vst.msk [vmem:[%s545_s27] sm:$0xff] %vm649_vm2, %v3185_v23  ;;  %3190 = vst.msk [vmem:[%s545_s27 + $0x8] sm:$0xff] %vm649_vm2, %v3186_v24 }
 0xcd4   : > { %3191 = vst.msk [vmem:[%s545_s27 + $0x10] sm:$0xff] %vm649_vm2, %v3187_v25 }
 0xcd5   : > { %3192 = vst.msk [vmem:[%s545_s27 + $0x18] sm:$0x3f] %vm2240_vm15, %v3188_v26 }
 0xcd6 PF: > { %s25_s20 = sadd.s32 1, %s4001_s20   ;;  %s4682_s18 = smov %s3997_s19 }
 0xcd7   : > { %p22_p5 = scmp.ge.s32.totalorder %s25_s20, 4   ;;  %s4683_s19 = smov %s4685_s21 }
 0xcd9   :  { %24 = sbr.rel (!%p22_p5) target bundleno = 2 (0x2), region = 157 }

</bundles_post_ra>
